<compile_context>
chip_gen: v5e
topology: v5e:2x2
jax: 0.10.0
libtpu: 0.0.40
codegen_flags: <defaults>
</compile_context>

<pallas_src>
import functools

import jax
import jax.numpy as jnp
from jax.experimental import pallas as pl
from jax.experimental.pallas import tpu as pltpu


def _round_up(x, m):
    return ((x + m - 1) // m) * m


def _choose_tiles(n):
    """Pick (tile_m, tile_k, n_pad): row tile, reduction tile, padded node count."""
    n128 = _round_up(n, 128)
    if n128 >= 2048:
        tile_m, tile_k = 1024, 512
    elif n128 >= 1024:
        tile_m, tile_k = 512, 512        # keeps parallel row axis >= 2 (v7x: 2 TCs)
    elif n128 >= 512:
        tile_m, tile_k = 256, 256
    else:
        # Tiny graph: single reduction block; still split rows in two when
        # possible so v7x's second TensorCore has work (row dim only needs 8-align).
        tile_k = n128
        tile_m = n128 // 2 if (n128 >= 256 and (n128 // 2) % 8 == 0) else n128
    n_pad = _round_up(n128, max(tile_m, tile_k))
    return tile_m, tile_k, n_pad


# ----------------------------------------------------------------------------
# Fused per-layer kernel:  out = (deg_inv * (C @ X)) @ W_l + X @ W_r + b (+ReLU)
# ----------------------------------------------------------------------------
def _sage_layer_kernel(c_ref, x_agg_ref, x_root_ref, dinv_ref, wl_ref, wr_ref,
                       b_ref, o_ref, acc_ref, *, apply_relu):
    k = pl.program_id(1)

    @pl.when(k == 0)
    def _zero():
        acc_ref[...] = jnp.zeros_like(acc_ref)

    # N^2 work: int8 counts -> bf16 in VMEM (chip-agnostic), bf16 MXU matmul,
    # f32 accumulation in VMEM scratch.
    c_bf16 = c_ref[...].astype(jnp.float32).astype(jnp.bfloat16)
    acc_ref[...] += jnp.dot(c_bf16, x_agg_ref[...],
                            preferred_element_type=jnp.float32)

    @pl.when(k == pl.num_programs(1) - 1)
    def _finalize():
        # Exact mean aggregation: f32 per-row 1/deg scaling of the count-sum.
        z = acc_ref[...] * dinv_ref[...]
        neigh = jnp.dot(z.astype(jnp.bfloat16), wl_ref[...],
                        preferred_element_type=jnp.float32)
        root = jnp.dot(x_root_ref[...], wr_ref[...],
                       preferred_element_type=jnp.float32)
        out = neigh + root + b_ref[...]
        if apply_relu:
            out = jnp.maximum(out, 0.0)
        o_ref[...] = out.astype(o_ref.dtype)


def _sage_layer(c_i8, x_bf16, deg_inv, w_l, w_r, b, *, tile_m, tile_k,
                apply_relu, out_dtype):
    n_pad, f_in_pad = x_bf16.shape
    f_out_pad = w_l.shape[1]
    grid = (n_pad // tile_m, n_pad // tile_k)
    kernel = functools.partial(_sage_layer_kernel, apply_relu=apply_relu)
    return pl.pallas_call(
        kernel,
        out_shape=jax.ShapeDtypeStruct((n_pad, f_out_pad), out_dtype),
        grid=grid,
        in_specs=[
            pl.BlockSpec((tile_m, tile_k), lambda i, k: (i, k)),        # C counts (int8)
            pl.BlockSpec((tile_k, f_in_pad), lambda i, k: (k, 0)),      # X rows k (aggregation)
            pl.BlockSpec((tile_m, f_in_pad), lambda i, k: (i, 0)),      # X rows i (root term)
            pl.BlockSpec((tile_m, 1), lambda i, k: (i, 0)),             # 1/deg_in rows i (f32)
            pl.BlockSpec((f_in_pad, f_out_pad), lambda i, k: (0, 0)),   # W_l (resident)
            pl.BlockSpec((f_in_pad, f_out_pad), lambda i, k: (0, 0)),   # W_r (resident)
            pl.BlockSpec((1, f_out_pad), lambda i, k: (0, 0)),          # bias (resident)
        ],
        out_specs=pl.BlockSpec((tile_m, f_out_pad), lambda i, k: (i, 0)),
        scratch_shapes=[pltpu.VMEM((tile_m, f_in_pad), jnp.float32)],
        compiler_params=pltpu.CompilerParams(
            dimension_semantics=("parallel", "arbitrary")),
    )(c_i8, x_bf16, x_bf16, deg_inv, w_l, w_r, b)


# ----------------------------------------------------------------------------
# Plain-JAX glue: params, adjacency build, layer loop
# ----------------------------------------------------------------------------
def init_gnn_params(key, in_channels, hidden_channels, out_channels, num_layers):
    """Deterministic synthetic parameters matching PyG SAGEConv shapes."""
    dims = [in_channels] + [hidden_channels] * (num_layers - 1) + [out_channels]
    params = []
    for li in range(num_layers):
        f_in, f_out = dims[li], dims[li + 1]
        key, k1, k2, k3 = jax.random.split(key, 4)
        scale = 1.0 / jnp.sqrt(jnp.float32(f_in))
        w_l = jax.random.normal(k1, (f_in, f_out), jnp.float32) * scale
        w_r = jax.random.normal(k2, (f_in, f_out), jnp.float32) * scale
        b = jax.random.normal(k3, (1, f_out), jnp.float32) * 0.1
        params.append((w_l, w_r, b))
    return params


def build_adjacency(edge_index, num_nodes, n_pad):
    """int8 edge counts (built directly at padded size, kernel dtype) + f32 1/deg_in."""
    src, dst = edge_index[0], edge_index[1]
    counts = jnp.zeros((n_pad, n_pad), jnp.int8)
    counts = counts.at[dst, src].add(jnp.ones_like(src, jnp.int8))
    deg = jnp.zeros((n_pad,), jnp.float32).at[dst].add(1.0)
    deg_inv = jnp.where(deg > 0.0, 1.0 / jnp.maximum(deg, 1.0), 0.0)
    return counts, deg_inv.reshape(n_pad, 1)


def gnn_forward(x, edge_index, params):
    """Eval-mode forward of the GNN module (dropout == identity)."""
    n, f_in = x.shape
    tile_m, tile_k, n_pad = _choose_tiles(n)

    # int8 counts + exact f32 1/deg, built once and reused by every layer.
    counts_i8, deg_inv = build_adjacency(edge_index, n, n_pad)

    f_in_pad = _round_up(f_in, 128)
    h = jnp.pad(x, ((0, n_pad - n), (0, f_in_pad - f_in))).astype(jnp.bfloat16)

    num_layers = len(params)
    for li, (w_l, w_r, b) in enumerate(params):
        f_in_l, f_out = w_l.shape
        f_in_pad_l = _round_up(f_in_l, 128)
        f_out_pad = _round_up(f_out, 128)

        wl_p = (jnp.zeros((f_in_pad_l, f_out_pad), jnp.float32)
                .at[:f_in_l, :f_out].set(w_l).astype(jnp.bfloat16))
        wr_p = (jnp.zeros((f_in_pad_l, f_out_pad), jnp.float32)
                .at[:f_in_l, :f_out].set(w_r).astype(jnp.bfloat16))
        b_p = jnp.zeros((1, f_out_pad), jnp.float32).at[:, :f_out].set(b)

        is_last = li == num_layers - 1
        # NOTE: padded rows of h carry bias/ReLU garbage after each layer; this is
        # harmless because padded columns of C are zero and we slice [:n] at the end.
        h = _sage_layer(counts_i8, h, deg_inv, wl_p, wr_p, b_p,
                        tile_m=tile_m, tile_k=tile_k,
                        apply_relu=not is_last,
                        out_dtype=jnp.float32 if is_last else jnp.bfloat16)

    out_channels = params[-1][0].shape[1]
    return h[:n, :out_channels]


def gnn_reference(x, edge_index, params):
    """Pure-JAX f32 reference of the same forward."""
    n = x.shape[0]
    src, dst = edge_index[0], edge_index[1]
    counts = jnp.zeros((n, n), jnp.float32).at[dst, src].add(1.0)
    deg = counts.sum(axis=1, keepdims=True)
    A = counts / jnp.maximum(deg, 1.0)
    h = x
    for i, (w_l, w_r, b) in enumerate(params):
        out = (A @ h) @ w_l + h @ w_r + b
        if i != len(params) - 1:
            out = jnp.maximum(out, 0.0)
        h = out
    return h


if __name__ == "__main__":
    key = jax.random.PRNGKey(0)

    # Small synthetic graph consistent with the module's forward.
    num_nodes = 300
    in_channels = 16
    hidden_channels = 32
    out_channels = 8
    num_layers = 3

    key, kx, ke = jax.random.split(key, 3)
    x = jax.random.normal(kx, (num_nodes, in_channels), jnp.float32)

    # Deterministic edge_index [2, E]: a ring plus some pseudo-random edges.
    ring_src = jnp.arange(num_nodes, dtype=jnp.int32)
    ring_dst = (ring_src + 1) % num_nodes
    extra_src = jax.random.randint(ke, (128,), 0, num_nodes, dtype=jnp.int32)
    extra_dst = (extra_src * 7 + 3) % num_nodes
    edge_index = jnp.stack(
        [jnp.concatenate([ring_src, extra_src]),
         jnp.concatenate([ring_dst, extra_dst])], axis=0)

    params = init_gnn_params(key, in_channels, hidden_channels, out_channels, num_layers)

    fwd = jax.jit(gnn_forward)
    out = fwd(x, edge_index, params)
    jax.block_until_ready(out)
    assert out.shape == (num_nodes, out_channels)
    assert bool(jnp.all(jnp.isfinite(out)))

    # Correctness check vs. f32 reference (kernel uses bf16 MXU operands; the
    # adjacency / 1-over-degree path is exact, so only bf16 rounding remains).
    ref = gnn_reference(x, edge_index, params)
    max_err = float(jnp.max(jnp.abs(out - ref)))
    scale = float(jnp.max(jnp.abs(ref)))
    assert max_err <= 0.05 * scale + 1e-3, (max_err, scale)

    print("KERNEL_OK")
</pallas_src>

<mosaic_0001>
module attributes {stable_mosaic.version = 11 : i64} {
  func.func @_sage_layer_kernel(%arg0: i32, %arg1: i32, %arg2: memref<192x384xi8, #tpu.memory_space<vmem>>, %arg3: memref<384x128xbf16, #tpu.memory_space<vmem>>, %arg4: memref<192x128xbf16, #tpu.memory_space<vmem>>, %arg5: memref<192x1xf32, #tpu.memory_space<vmem>>, %arg6: memref<128x128xbf16, #tpu.memory_space<vmem>>, %arg7: memref<128x128xbf16, #tpu.memory_space<vmem>>, %arg8: memref<1x128xf32, #tpu.memory_space<vmem>>, %arg9: memref<192x128xbf16, #tpu.memory_space<vmem>>, %arg10: memref<192x128xf32, #tpu.memory_space<vmem>>) attributes {dimension_semantics = [#tpu.dimension_semantics<parallel>, #tpu.dimension_semantics<arbitrary>], iteration_bounds = array<i64: 2, 1>, scalar_prefetch = 0 : i64, scratch_operands = 1 : i64, tpu.core_type = #tpu.core_type<tc>, window_params = [{transform_indices = @transform_0, window_bounds = array<i64: 192, 384>}, {transform_indices = @transform_1, window_bounds = array<i64: 384, 128>}, {transform_indices = @transform_2, window_bounds = array<i64: 192, 128>}, {transform_indices = @transform_3, window_bounds = array<i64: 192, 1>}, {pipeline_mode = #tpu.pipeline_mode<synchronous>, transform_indices = @transform_4, window_bounds = array<i64: 128, 128>}, {pipeline_mode = #tpu.pipeline_mode<synchronous>, transform_indices = @transform_5, window_bounds = array<i64: 128, 128>}, {pipeline_mode = #tpu.pipeline_mode<synchronous>, transform_indices = @transform_6, window_bounds = array<i64: 1, 128>}, {transform_indices = @transform_7, window_bounds = array<i64: 192, 128>}]} {
    %c0_i32 = arith.constant 0 : i32
    %0 = arith.cmpi eq, %arg1, %c0_i32 : i32
    %1 = arith.extui %0 : i1 to i32
    %c0_i32_0 = arith.constant 0 : i32
    %2 = arith.cmpi ne, %1, %c0_i32_0 : i32
    scf.if %2 {
      %cst_10 = arith.constant 0.000000e+00 : f32
      %14 = vector.broadcast %cst_10 : f32 to vector<192x128xf32>
      %c0_11 = arith.constant 0 : index
      %c0_12 = arith.constant 0 : index
      %15 = vector.load %arg10[%c0_11, %c0_12] : memref<192x128xf32, #tpu.memory_space<vmem>>, vector<192x128xf32>
      tpu.vector_store %arg10[%c0_11, %c0_12], %14 {strides = array<i32>} : memref<192x128xf32, #tpu.memory_space<vmem>>, vector<192x128xf32>,
    } else {
    }
    %c0 = arith.constant 0 : index
    %c0_1 = arith.constant 0 : index
    %3 = vector.load %arg2[%c0, %c0_1] : memref<192x384xi8, #tpu.memory_space<vmem>>, vector<192x384xi8>
    %4 = arith.sitofp %3 : vector<192x384xi8> to vector<192x384xf32>
    %5 = arith.truncf %4 : vector<192x384xf32> to vector<192x384xbf16>
    %c0_2 = arith.constant 0 : index
    %c0_3 = arith.constant 0 : index
    %6 = vector.load %arg10[%c0_2, %c0_3] : memref<192x128xf32, #tpu.memory_space<vmem>>, vector<192x128xf32>
    %c0_4 = arith.constant 0 : index
    %c0_5 = arith.constant 0 : index
    %7 = vector.load %arg3[%c0_4, %c0_5] : memref<384x128xbf16, #tpu.memory_space<vmem>>, vector<384x128xbf16>
    %cst = arith.constant dense<0.000000e+00> : vector<192x128xf32>
    %8 = tpu.matmul %5, %7, %cst {dimension_numbers = #tpu.dot_dimension_numbers<[1], [0], [0], [1], [0, 0, 1, 1], [], []>} : vector<192x384xbf16>, vector<384x128xbf16>, vector<192x128xf32> -> vector<192x128xf32>
    %9 = arith.addf %6, %8 : vector<192x128xf32>
    %c0_6 = arith.constant 0 : index
    %c0_7 = arith.constant 0 : index
    %10 = vector.load %arg10[%c0_6, %c0_7] : memref<192x128xf32, #tpu.memory_space<vmem>>, vector<192x128xf32>
    tpu.vector_store %arg10[%c0_6, %c0_7], %9 {strides = array<i32>} : memref<192x128xf32, #tpu.memory_space<vmem>>, vector<192x128xf32>,
    %c0_i32_8 = arith.constant 0 : i32
    %11 = arith.cmpi eq, %arg1, %c0_i32_8 : i32
    %12 = arith.extui %11 : i1 to i32
    %c0_i32_9 = arith.constant 0 : i32
    %13 = arith.cmpi ne, %12, %c0_i32_9 : i32
    scf.if %13 {
      %c0_10 = arith.constant 0 : index
      %c0_11 = arith.constant 0 : index
      %14 = vector.load %arg10[%c0_10, %c0_11] : memref<192x128xf32, #tpu.memory_space<vmem>>, vector<192x128xf32>
      %c0_12 = arith.constant 0 : index
      %c0_13 = arith.constant 0 : index
      %15 = vector.load %arg5[%c0_12, %c0_13] : memref<192x1xf32, #tpu.memory_space<vmem>>, vector<192x1xf32>
      %16 = vector.broadcast %15 : vector<192x1xf32> to vector<192x128xf32>
      %17 = arith.mulf %14, %16 : vector<192x128xf32>
      %18 = arith.truncf %17 : vector<192x128xf32> to vector<192x128xbf16>
      %c0_14 = arith.constant 0 : index
      %c0_15 = arith.constant 0 : index
      %19 = vector.load %arg6[%c0_14, %c0_15] : memref<128x128xbf16, #tpu.memory_space<vmem>>, vector<128x128xbf16>
      %cst_16 = arith.constant dense<0.000000e+00> : vector<192x128xf32>
      %20 = tpu.matmul %18, %19, %cst_16 {dimension_numbers = #tpu.dot_dimension_numbers<[1], [0], [0], [1], [0, 0, 1, 1], [], []>} : vector<192x128xbf16>, vector<128x128xbf16>, vector<192x128xf32> -> vector<192x128xf32>
      %c0_17 = arith.constant 0 : index
      %c0_18 = arith.constant 0 : index
      %21 = vector.load %arg4[%c0_17, %c0_18] : memref<192x128xbf16, #tpu.memory_space<vmem>>, vector<192x128xbf16>
      %c0_19 = arith.constant 0 : index
      %c0_20 = arith.constant 0 : index
      %22 = vector.load %arg7[%c0_19, %c0_20] : memref<128x128xbf16, #tpu.memory_space<vmem>>, vector<128x128xbf16>
      %cst_21 = arith.constant dense<0.000000e+00> : vector<192x128xf32>
      %23 = tpu.matmul %21, %22, %cst_21 {dimension_numbers = #tpu.dot_dimension_numbers<[1], [0], [0], [1], [0, 0, 1, 1], [], []>} : vector<192x128xbf16>, vector<128x128xbf16>, vector<192x128xf32> -> vector<192x128xf32>
      %24 = arith.addf %20, %23 : vector<192x128xf32>
      %c0_22 = arith.constant 0 : index
      %c0_23 = arith.constant 0 : index
      %25 = vector.load %arg8[%c0_22, %c0_23] : memref<1x128xf32, #tpu.memory_space<vmem>>, vector<1x128xf32>
      %26 = vector.broadcast %25 : vector<1x128xf32> to vector<192x128xf32>
      %27 = arith.addf %24, %26 : vector<192x128xf32>
      %cst_24 = arith.constant 0.000000e+00 : f32
      %28 = vector.broadcast %cst_24 : f32 to vector<192x128xf32>
      %29 = arith.maximumf %27, %28 : vector<192x128xf32>
      %30 = arith.truncf %29 : vector<192x128xf32> to vector<192x128xbf16>
      %c0_25 = arith.constant 0 : index
      %c0_26 = arith.constant 0 : index
      %31 = vector.load %arg9[%c0_25, %c0_26] : memref<192x128xbf16, #tpu.memory_space<vmem>>, vector<192x128xbf16>
      tpu.vector_store %arg9[%c0_25, %c0_26], %30 {strides = array<i32>} : memref<192x128xbf16, #tpu.memory_space<vmem>>, vector<192x128xbf16>,
    } else {
    }
    return
  }
  func.func @transform_0(%arg0: i32, %arg1: i32) -> (i32, i32) {
    %c0_i32 = arith.constant 0 : i32
    return %arg0, %arg1 : i32, i32
  }
  func.func @transform_1(%arg0: i32, %arg1: i32) -> (i32, i32) {
    %c0_i32 = arith.constant 0 : i32
    %c0_i32_0 = arith.constant 0 : i32
    return %arg1, %c0_i32 : i32, i32
  }
  func.func @transform_2(%arg0: i32, %arg1: i32) -> (i32, i32) {
    %c0_i32 = arith.constant 0 : i32
    %c0_i32_0 = arith.constant 0 : i32
    return %arg0, %c0_i32 : i32, i32
  }
  func.func @transform_3(%arg0: i32, %arg1: i32) -> (i32, i32) {
    %c0_i32 = arith.constant 0 : i32
    %c0_i32_0 = arith.constant 0 : i32
    return %arg0, %c0_i32 : i32, i32
  }
  func.func @transform_4(%arg0: i32, %arg1: i32) -> (i32, i32) {
    %c0_i32 = arith.constant 0 : i32
    %c0_i32_0 = arith.constant 0 : i32
    %c0_i32_1 = arith.constant 0 : i32
    return %c0_i32, %c0_i32_0 : i32, i32
  }
  func.func @transform_5(%arg0: i32, %arg1: i32) -> (i32, i32) {
    %c0_i32 = arith.constant 0 : i32
    %c0_i32_0 = arith.constant 0 : i32
    %c0_i32_1 = arith.constant 0 : i32
    return %c0_i32, %c0_i32_0 : i32, i32
  }
  func.func @transform_6(%arg0: i32, %arg1: i32) -> (i32, i32) {
    %c0_i32 = arith.constant 0 : i32
    %c0_i32_0 = arith.constant 0 : i32
    %c0_i32_1 = arith.constant 0 : i32
    return %c0_i32, %c0_i32_0 : i32, i32
  }
  func.func @transform_7(%arg0: i32, %arg1: i32) -> (i32, i32) {
    %c0_i32 = arith.constant 0 : i32
    %c0_i32_0 = arith.constant 0 : i32
    return %arg0, %c0_i32 : i32, i32
  }
}

module attributes {stable_mosaic.version = 11 : i64} {
  func.func @_sage_layer_kernel(%arg0: i32, %arg1: i32, %arg2: memref<192x384xi8, #tpu.memory_space<vmem>>, %arg3: memref<384x128xbf16, #tpu.memory_space<vmem>>, %arg4: memref<192x128xbf16, #tpu.memory_space<vmem>>, %arg5: memref<192x1xf32, #tpu.memory_space<vmem>>, %arg6: memref<128x128xbf16, #tpu.memory_space<vmem>>, %arg7: memref<128x128xbf16, #tpu.memory_space<vmem>>, %arg8: memref<1x128xf32, #tpu.memory_space<vmem>>, %arg9: memref<192x128xf32, #tpu.memory_space<vmem>>, %arg10: memref<192x128xf32, #tpu.memory_space<vmem>>) attributes {dimension_semantics = [#tpu.dimension_semantics<parallel>, #tpu.dimension_semantics<arbitrary>], iteration_bounds = array<i64: 2, 1>, scalar_prefetch = 0 : i64, scratch_operands = 1 : i64, tpu.core_type = #tpu.core_type<tc>, window_params = [{transform_indices = @transform_0, window_bounds = array<i64: 192, 384>}, {transform_indices = @transform_1, window_bounds = array<i64: 384, 128>}, {transform_indices = @transform_2, window_bounds = array<i64: 192, 128>}, {transform_indices = @transform_3, window_bounds = array<i64: 192, 1>}, {pipeline_mode = #tpu.pipeline_mode<synchronous>, transform_indices = @transform_4, window_bounds = array<i64: 128, 128>}, {pipeline_mode = #tpu.pipeline_mode<synchronous>, transform_indices = @transform_5, window_bounds = array<i64: 128, 128>}, {pipeline_mode = #tpu.pipeline_mode<synchronous>, transform_indices = @transform_6, window_bounds = array<i64: 1, 128>}, {transform_indices = @transform_7, window_bounds = array<i64: 192, 128>}]} {
    %c0_i32 = arith.constant 0 : i32
    %0 = arith.cmpi eq, %arg1, %c0_i32 : i32
    %1 = arith.extui %0 : i1 to i32
    %c0_i32_0 = arith.constant 0 : i32
    %2 = arith.cmpi ne, %1, %c0_i32_0 : i32
    scf.if %2 {
      %cst_10 = arith.constant 0.000000e+00 : f32
      %14 = vector.broadcast %cst_10 : f32 to vector<192x128xf32>
      %c0_11 = arith.constant 0 : index
      %c0_12 = arith.constant 0 : index
      %15 = vector.load %arg10[%c0_11, %c0_12] : memref<192x128xf32, #tpu.memory_space<vmem>>, vector<192x128xf32>
      tpu.vector_store %arg10[%c0_11, %c0_12], %14 {strides = array<i32>} : memref<192x128xf32, #tpu.memory_space<vmem>>, vector<192x128xf32>,
    } else {
    }
    %c0 = arith.constant 0 : index
    %c0_1 = arith.constant 0 : index
    %3 = vector.load %arg2[%c0, %c0_1] : memref<192x384xi8, #tpu.memory_space<vmem>>, vector<192x384xi8>
    %4 = arith.sitofp %3 : vector<192x384xi8> to vector<192x384xf32>
    %5 = arith.truncf %4 : vector<192x384xf32> to vector<192x384xbf16>
    %c0_2 = arith.constant 0 : index
    %c0_3 = arith.constant 0 : index
    %6 = vector.load %arg10[%c0_2, %c0_3] : memref<192x128xf32, #tpu.memory_space<vmem>>, vector<192x128xf32>
    %c0_4 = arith.constant 0 : index
    %c0_5 = arith.constant 0 : index
    %7 = vector.load %arg3[%c0_4, %c0_5] : memref<384x128xbf16, #tpu.memory_space<vmem>>, vector<384x128xbf16>
    %cst = arith.constant dense<0.000000e+00> : vector<192x128xf32>
    %8 = tpu.matmul %5, %7, %cst {dimension_numbers = #tpu.dot_dimension_numbers<[1], [0], [0], [1], [0, 0, 1, 1], [], []>} : vector<192x384xbf16>, vector<384x128xbf16>, vector<192x128xf32> -> vector<192x128xf32>
    %9 = arith.addf %6, %8 : vector<192x128xf32>
    %c0_6 = arith.constant 0 : index
    %c0_7 = arith.constant 0 : index
    %10 = vector.load %arg10[%c0_6, %c0_7] : memref<192x128xf32, #tpu.memory_space<vmem>>, vector<192x128xf32>
    tpu.vector_store %arg10[%c0_6, %c0_7], %9 {strides = array<i32>} : memref<192x128xf32, #tpu.memory_space<vmem>>, vector<192x128xf32>,
    %c0_i32_8 = arith.constant 0 : i32
    %11 = arith.cmpi eq, %arg1, %c0_i32_8 : i32
    %12 = arith.extui %11 : i1 to i32
    %c0_i32_9 = arith.constant 0 : i32
    %13 = arith.cmpi ne, %12, %c0_i32_9 : i32
    scf.if %13 {
      %c0_10 = arith.constant 0 : index
      %c0_11 = arith.constant 0 : index
      %14 = vector.load %arg10[%c0_10, %c0_11] : memref<192x128xf32, #tpu.memory_space<vmem>>, vector<192x128xf32>
      %c0_12 = arith.constant 0 : index
      %c0_13 = arith.constant 0 : index
      %15 = vector.load %arg5[%c0_12, %c0_13] : memref<192x1xf32, #tpu.memory_space<vmem>>, vector<192x1xf32>
      %16 = vector.broadcast %15 : vector<192x1xf32> to vector<192x128xf32>
      %17 = arith.mulf %14, %16 : vector<192x128xf32>
      %18 = arith.truncf %17 : vector<192x128xf32> to vector<192x128xbf16>
      %c0_14 = arith.constant 0 : index
      %c0_15 = arith.constant 0 : index
      %19 = vector.load %arg6[%c0_14, %c0_15] : memref<128x128xbf16, #tpu.memory_space<vmem>>, vector<128x128xbf16>
      %cst_16 = arith.constant dense<0.000000e+00> : vector<192x128xf32>
      %20 = tpu.matmul %18, %19, %cst_16 {dimension_numbers = #tpu.dot_dimension_numbers<[1], [0], [0], [1], [0, 0, 1, 1], [], []>} : vector<192x128xbf16>, vector<128x128xbf16>, vector<192x128xf32> -> vector<192x128xf32>
      %c0_17 = arith.constant 0 : index
      %c0_18 = arith.constant 0 : index
      %21 = vector.load %arg4[%c0_17, %c0_18] : memref<192x128xbf16, #tpu.memory_space<vmem>>, vector<192x128xbf16>
      %c0_19 = arith.constant 0 : index
      %c0_20 = arith.constant 0 : index
      %22 = vector.load %arg7[%c0_19, %c0_20] : memref<128x128xbf16, #tpu.memory_space<vmem>>, vector<128x128xbf16>
      %cst_21 = arith.constant dense<0.000000e+00> : vector<192x128xf32>
      %23 = tpu.matmul %21, %22, %cst_21 {dimension_numbers = #tpu.dot_dimension_numbers<[1], [0], [0], [1], [0, 0, 1, 1], [], []>} : vector<192x128xbf16>, vector<128x128xbf16>, vector<192x128xf32> -> vector<192x128xf32>
      %24 = arith.addf %20, %23 : vector<192x128xf32>
      %c0_22 = arith.constant 0 : index
      %c0_23 = arith.constant 0 : index
      %25 = vector.load %arg8[%c0_22, %c0_23] : memref<1x128xf32, #tpu.memory_space<vmem>>, vector<1x128xf32>
      %26 = vector.broadcast %25 : vector<1x128xf32> to vector<192x128xf32>
      %27 = arith.addf %24, %26 : vector<192x128xf32>
      %c0_24 = arith.constant 0 : index
      %c0_25 = arith.constant 0 : index
      %28 = vector.load %arg9[%c0_24, %c0_25] : memref<192x128xf32, #tpu.memory_space<vmem>>, vector<192x128xf32>
      tpu.vector_store %arg9[%c0_24, %c0_25], %27 {strides = array<i32>} : memref<192x128xf32, #tpu.memory_space<vmem>>, vector<192x128xf32>,
    } else {
    }
    return
  }
  func.func @transform_0(%arg0: i32, %arg1: i32) -> (i32, i32) {
    %c0_i32 = arith.constant 0 : i32
    return %arg0, %arg1 : i32, i32
  }
  func.func @transform_1(%arg0: i32, %arg1: i32) -> (i32, i32) {
    %c0_i32 = arith.constant 0 : i32
    %c0_i32_0 = arith.constant 0 : i32
    return %arg1, %c0_i32 : i32, i32
  }
  func.func @transform_2(%arg0: i32, %arg1: i32) -> (i32, i32) {
    %c0_i32 = arith.constant 0 : i32
    %c0_i32_0 = arith.constant 0 : i32
    return %arg0, %c0_i32 : i32, i32
  }
  func.func @transform_3(%arg0: i32, %arg1: i32) -> (i32, i32) {
    %c0_i32 = arith.constant 0 : i32
    %c0_i32_0 = arith.constant 0 : i32
    return %arg0, %c0_i32 : i32, i32
  }
  func.func @transform_4(%arg0: i32, %arg1: i32) -> (i32, i32) {
    %c0_i32 = arith.constant 0 : i32
    %c0_i32_0 = arith.constant 0 : i32
    %c0_i32_1 = arith.constant 0 : i32
    return %c0_i32, %c0_i32_0 : i32, i32
  }
  func.func @transform_5(%arg0: i32, %arg1: i32) -> (i32, i32) {
    %c0_i32 = arith.constant 0 : i32
    %c0_i32_0 = arith.constant 0 : i32
    %c0_i32_1 = arith.constant 0 : i32
    return %c0_i32, %c0_i32_0 : i32, i32
  }
  func.func @transform_6(%arg0: i32, %arg1: i32) -> (i32, i32) {
    %c0_i32 = arith.constant 0 : i32
    %c0_i32_0 = arith.constant 0 : i32
    %c0_i32_1 = arith.constant 0 : i32
    return %c0_i32, %c0_i32_0 : i32, i32
  }
  func.func @transform_7(%arg0: i32, %arg1: i32) -> (i32, i32) {
    %c0_i32 = arith.constant 0 : i32
    %c0_i32_0 = arith.constant 0 : i32
    return %arg0, %c0_i32 : i32, i32
  }
}

</mosaic_0001>

<bundles_post_ra>
// kernel: gnn_forward.3
= control target key start
LH: loop header
LB: loop body
LE: loop exit
PB: predicated region body
PF: predicated region fallthrough
CT: control target
= control target key end

     0   :  { %s2323_s24 = smov 0   ;;  %s2325_s25 = smov 0   ;;  %s2779_s0 = inlined_call_operand.vmem [shape: s8[384,384], index: 0, kind: input, shape index: {}]   ;;  %s2780_s1 = inlined_call_operand.vmem [shape: bf16[384,128], index: 1, kind: input, shape index: {}, may-alias: {1,2}]   ;;  %s2781_s2 = inlined_call_operand.vmem [shape: bf16[384,128], index: 2, kind: input, shape index: {}, may-alias: {1,2}]   ;;  %s2782_s3 = inlined_call_operand.vmem [shape: f32[384,1], index: 3, kind: input, shape index: {}]   ;;  %s2783_s4 = inlined_call_operand.vmem [shape: bf16[128,128], index: 4, kind: input, shape index: {}]   ;;  %s2784_s5 = inlined_call_operand.vmem [shape: bf16[128,128], index: 5, kind: input, shape index: {}]   ;;  %s2785_s6 = inlined_call_operand.vmem [shape: f32[1,128], index: 6, kind: input, shape index: {}]   ;;  %s2786_s7 = inlined_call_operand.vmem [shape: bf16[384,128], index: 7, kind: output, shape index: {}]  }
   0x1   :  { %s2327_s26 = smov 0  }
   0x2 LB: > { %s29_s27 = sadd.s32 1, %s2276_s25  ;;  %p1866_p0 = scmp.ge.s32.totalorder %s2280_s26, 1  ;;  %s2280_s26 = sphi %s2327_s26, %s17_s26   ;;  %s2276_s25 = sphi %s2325_s25, %s2788_s25   ;;  %s2272_s24 = sphi %s2323_s24, %s2787_s24  }
   0x3   : > { %p31_p1 = scmp.ge.s32.totalorder %s29_s27, 2  ;;  %p291_p2 = scmp.lt.s32.totalorder %s2280_s26, 3 }
   0x5   : > { %s2790_s27 = smov (%p31_p1, %s29_s27), 0  ;;  %p292_p3 = pnand %p1866_p0, %p291_p2 }
   0x6   : > { %s343_s30 = smul.u32 (!%p292_p3), 24, %s2272_s24 }
   0x7   : > { %295 = sbr.rel (%p292_p3) target bundleno = 557 (0x22d), region = 48 }
   0x8   : > { %p345_p4 = scmp.lt.s32.totalorder (!%p292_p3), %s343_s30, 47 }
   0xc   : > { %v2088_v0 = vld [vmem:[%s2780_s1 + $0x38] sm:$0xff]  ;;  %v2087_v1 = vld [vmem:[%s2780_s1 + $0x30] sm:$0xff]  ;;  %s2792_s30 = smov (!%p345_p4, %s343_s30), 47  ;;  %v2282_v2 = vmov 0   ;;  %v2086_v3 = vld [vmem:[%s2780_s1 + $0x28] sm:$0xff] }
   0xd   : > { %2204 = vmatpush.bf16.msra.mxu1 %v2088_v0  ;;  %2205 = vmatpush.bf16.msra.mxu2 %v2088_v0  ;;  %s1869_s12 = sshll.u32 %s2792_s30, 3  ;;  %v2085_v5 = vld [vmem:[%s2780_s1 + $0x20] sm:$0xff]  ;;  %s2228_s18 = smul.u32 6, %s2792_s30  ;;  %v2084_v6 = vld [vmem:[%s2780_s1 + $0x18] sm:$0xff]  ;;  %v2083_v7 = vld [vmem:[%s2780_s1 + $0x10] sm:$0xff] }
   0xe   : > { %827 = vmatpush.bf16.msra.mxu0 %v2088_v0  ;;  %2206 = vmatpush.bf16.msra.mxu3 %v2088_v0  ;;  %s2356_s15 = scalar_lea.vmem %s2782_s3, %s1869_s12  ;;  %v2082_v18 = vld [vmem:[%s2780_s1 + $0x8] sm:$0xff]  ;;  %v2081_v24 = vld [vmem:[%s2780_s1] sm:$0xff]  ;;  %v2104_v25 = vld [vmem:[%s2780_s1 + $0xb8] sm:$0xff]  ;;  %s1868_s13 = sshll.u32 %s2792_s30, 2 }
   0xf   : > { %2254 = vset.pattern.permute.xlu0 %v2282_v2  ;;  %2255 = vset.pattern.permute.xlu1 %v2282_v2  ;;  %v1109_v4 = vld [vmem:[%s2356_s15] sm:$0xff]  ;;  %s2369_s23 = scalar_lea.vmem %s2779_s0, %s2228_s18  ;;  %v1110_v10 = vld [vmem:[%s2356_s15 + $0x8] sm:$0xff]  ;;  %v1111_v13 = vld [vmem:[%s2356_s15 + $0x10] sm:$0xff]  ;;  %s2620_s19 = scalar_lea.vmem %s2781_s2, %s1868_s13 }
  0x10   : > { %2256 = vset.pattern.permute.xlu2 %v2282_v2  ;;  %1135 = vperm.xlu0 %2254, %v1109_v4   ;;  %v2375_v8 = vld [vmem:[%s2369_s23 + $0x24] sm:$0x3f]  ;;  %v2378_v9 = vld [vmem:[%s2369_s23 + $0x2a] sm:$0x3f]  ;;  %v1115_v19 = vld [vmem:[%s2356_s15 + $0x30] sm:$0xff]  ;;  %s2729_s10 = scalar_lea.vmem %s2786_s7, %s1868_s13 }
  0x11   : > { %2207 = vmatpush.bf16.msra.mxu1 %v2087_v1  ;;  %2208 = vmatpush.bf16.msra.mxu2 %v2087_v1  ;;  %v2382_v11 = vld [vmem:[%s2369_s23 + $0x48] sm:$0x3f]  ;;  %v2385_v12 = vld [vmem:[%s2369_s23 + $0x4e] sm:$0x3f]  ;;  %v449_v14 = vunpack.c.0.s8 %v2375_v8  ;;  %v452_v15 = vunpack.c.0.s8 %v2378_v9  ;;  %v2096_v26 = vld [vmem:[%s2780_s1 + $0x78] sm:$0xff] }
  0x12   : > { %828 = vmatpush.bf16.msra.mxu0 %v2087_v1  ;;  %2209 = vmatpush.bf16.msra.mxu3 %v2087_v1  ;;  %v467_v16 = vunpack.c.0.s8 %v2382_v11  ;;  %v470_v17 = vunpack.c.0.s8 %v2385_v12  ;;  %v2103_v29 = vld [vmem:[%s2780_s1 + $0xb0] sm:$0xff]  ;;  %v1112_v32 = vld [vmem:[%s2356_s15 + $0x18] sm:$0xff]  ;;  %v1118_v33 = vld [vmem:[%s2356_s15 + $0x48] sm:$0xff] }
  0x13   : > { %1145 = vperm.xlu1 %2255, %v1111_v13   ;;  %v521_v20 = vcvt.s32.f32 %v449_v14  ;;  %v524_v21 = vcvt.s32.f32 %v452_v15  ;;  %v2095_v30 = vld [vmem:[%s2780_s1 + $0x70] sm:$0xff]  ;;  %v2423_v36 = vld [vmem:[%s2369_s23 + $0x5a] sm:$0x3f]  ;;  %v2102_v37 = vld [vmem:[%s2780_s1 + $0xa8] sm:$0xff] }
  0x14   : > { %v539_v22 = vcvt.s32.f32 %v467_v16  ;;  %v542_v23 = vcvt.s32.f32 %v470_v17  ;;  %v2412_v31 = vld [vmem:[%s2369_s23 + $0x30] sm:$0x3f]  ;;  %v2417_v34 = vld [vmem:[%s2369_s23 + $0x36] sm:$0x3f]  ;;  %v2094_v38 = vld [vmem:[%s2780_s1 + $0x68] sm:$0xff]  ;;  %v476_v45 = vunpack.c.0.s8 %v2423_v36 }
  0x15   : > { %2210 = vmatpush.bf16.msra.mxu1 %v2086_v3  ;;  %2211 = vmatpush.bf16.msra.mxu2 %v2086_v3  ;;  %v584_v27 = vpack.c.bf16 %v524_v21, %v521_v20  ;;  %v2420_v35 = vld [vmem:[%s2369_s23 + $0x54] sm:$0x3f]  ;;  %v2432_v39 = vld [vmem:[%s2369_s23] sm:$0x3f]  ;;  %v455_v40 = vunpack.c.0.s8 %v2412_v31  ;;  %v2436_v41 = vld [vmem:[%s2369_s23 + $0x6] sm:$0x3f]  ;;  %v458_v43 = vunpack.c.0.s8 %v2417_v34 }
  0x16   : > { %829 = vmatpush.bf16.msra.mxu0 %v2086_v3  ;;  %2212 = vmatpush.bf16.msra.mxu3 %v2086_v3  ;;  %v593_v28 = vpack.c.bf16 %v542_v23, %v539_v22  ;;  %v431_v42 = vunpack.c.0.s8 %v2432_v39  ;;  %v473_v44 = vunpack.c.0.s8 %v2420_v35  ;;  %v434_v46 = vunpack.c.0.s8 %v2436_v41  ;;  %v2101_v48 = vld [vmem:[%s2780_s1 + $0xa0] sm:$0xff]  ;;  %v1116_v50 = vld [vmem:[%s2356_s15 + $0x38] sm:$0xff]  ;;  %v2099_v62 = vld [vmem:[%s2780_s1 + $0x90] sm:$0xff] }
  0x17   : > { %v2093_v49 = vld [vmem:[%s2780_s1 + $0x60] sm:$0xff]  ;;  %v527_v52 = vcvt.s32.f32 %v455_v40  ;;  %v530_v53 = vcvt.s32.f32 %v458_v43  ;;  %v548_v55 = vcvt.s32.f32 %v476_v45  ;;  %v2100_v58 = vld [vmem:[%s2780_s1 + $0x98] sm:$0xff]  ;;  %v2091_v63 = vld [vmem:[%s2780_s1 + $0x50] sm:$0xff]  ;;  %v432_v45 = vunpack.c.1.s8 %v2432_v39 }
  0x18   : > { %1140 = vperm.xlu0 %2254, %v1110_v10   ;;  %v503_v47 = vcvt.s32.f32 %v431_v42  ;;  %v506_v51 = vcvt.s32.f32 %v434_v46  ;;  %v545_v54 = vcvt.s32.f32 %v473_v44  ;;  %v1121_v56 = vld [vmem:[%s2356_s15 + $0x60] sm:$0xff]  ;;  %v2092_v59 = vld [vmem:[%s2780_s1 + $0x58] sm:$0xff]  ;;  %v1119_v3 = vld [vmem:[%s2356_s15 + $0x50] sm:$0xff] }
  0x19   : > { %2213 = vmatpush.bf16.msra.mxu1 %v2085_v5  ;;  %2214 = vmatpush.bf16.msra.mxu2 %v2085_v5  ;;  %v587_v60 = vpack.c.bf16 %v530_v53, %v527_v52  ;;  %v2464_v0 = vld [vmem:[%s2369_s23 + $0x3c] sm:$0x3f]  ;;  %v2467_v1 = vld [vmem:[%s2369_s23 + $0x42] sm:$0x3f]  ;;  %v2098_v10 = vld [vmem:[%s2780_s1 + $0x88] sm:$0xff] }
  0x1a   : > { %830 = vmatpush.bf16.msra.mxu0 %v2085_v5  ;;  %2215 = vmatpush.bf16.msra.mxu3 %v2085_v5  ;;  %v575_v57 = vpack.c.bf16 %v506_v51, %v503_v47  ;;  %v596_v61 = vpack.c.bf16 %v548_v55, %v545_v54  ;;  %v2470_v2 = vld [vmem:[%s2369_s23 + $0x60] sm:$0x3f]  ;;  %v1124_v4 = vld [vmem:[%s2356_s15 + $0x78] sm:$0xff]  ;;  %v2475_v5 = vld [vmem:[%s2369_s23 + $0x66] sm:$0x3f]  ;;  %v461_v16 = vunpack.c.0.s8 %v2464_v0  ;;  %v464_v17 = vunpack.c.0.s8 %v2467_v1 }
  0x1b   : > { %1150 = vperm.xlu1 %2255, %v1112_v32   ;;  %v2090_v13 = vld [vmem:[%s2780_s1 + $0x48] sm:$0xff]  ;;  %v2097_v22 = vld [vmem:[%s2780_s1 + $0x80] sm:$0xff]  ;;  %v411_v42 = vld [vmem:[%s2369_s23 + $0x18] sm:$0x3f]  ;;  %v435_v47 = vunpack.c.1.s8 %v2436_v41  ;;  %v504_v55 = vcvt.s32.f32 %v432_v45 }
  0x1c   : > { %v2089_v23 = vld [vmem:[%s2780_s1 + $0x40] sm:$0xff]  ;;  %v1130_v40 = vld [vmem:[%s2356_s15 + $0xa8] sm:$0xff]  ;;  %v443_v44 = vunpack.c.0.s8 %v411_v42  ;;  %v1128_v53 = vld [vmem:[%s2356_s15 + $0x98] sm:$0xff] }
  0x1d   : > { %2216 = vmatpush.bf16.msra.mxu1 %v2084_v6  ;;  %2217 = vmatpush.bf16.msra.mxu2 %v2084_v6  ;;  %v412_v43 = vld [vmem:[%s2369_s23 + $0x1e] sm:$0x3f]  ;;  %v1114_v52 = vld [vmem:[%s2356_s15 + $0x28] sm:$0xff] }
  0x1e   : > { %831 = vmatpush.bf16.msra.mxu0 %v2084_v6  ;;  %2218 = vmatpush.bf16.msra.mxu3 %v2084_v6  ;;  %v2478_v6 = vld [vmem:[%s2369_s23 + $0xc] sm:$0x3f]  ;;  %v446_v46 = vunpack.c.0.s8 %v412_v43 }
  0x1f   : > { %v437_v14 = vunpack.c.0.s8 %v2478_v6 }
  0x20   : > { %1165 = vperm.xlu0 %2254, %v1115_v19   ;;  %v482_v19 = vunpack.c.0.s8 %v2475_v5  ;;  %v518_v51 = vcvt.s32.f32 %v446_v46  ;;  %v2530_v46 = vld [vmem:[%s2369_s23 + $0x6c] sm:$0x3f] }
  0x21   : > { %2219 = vmatpush.bf16.msra.mxu1 %v2083_v7  ;;  %2220 = vmatpush.bf16.msra.mxu2 %v2083_v7  ;;  %v509_v20 = vcvt.s32.f32 %v437_v14 }
  0x22   : > { %832 = vmatpush.bf16.msra.mxu0 %v2083_v7  ;;  %2221 = vmatpush.bf16.msra.mxu3 %v2083_v7  ;;  %v2481_v7 = vld [vmem:[%s2369_s23 + $0x12] sm:$0x3f] }
  0x23   : > { %1170 = vperm.xlu1 %2255, %v1116_v50   ;;  %v440_v15 = vunpack.c.0.s8 %v2481_v7  ;;  %v515_v50 = vcvt.s32.f32 %v443_v44 }
  0x25   : > { %2222 = vmatpush.bf16.msra.mxu1 %v2082_v18  ;;  %2223 = vmatpush.bf16.msra.mxu2 %v2082_v18  ;;  %v512_v21 = vcvt.s32.f32 %v440_v15  ;;  %v581_v54 = vpack.c.bf16 %v518_v51, %v515_v50  ;;  %v456_v51 = vunpack.c.1.s8 %v2412_v31 }
  0x26   : > { %833 = vmatpush.bf16.msra.mxu0 %v2082_v18  ;;  %2224 = vmatpush.bf16.msra.mxu3 %v2082_v18  ;;  %v479_v18 = vunpack.c.0.s8 %v2470_v2 }
  0x28   : > { %1180 = vperm.xlu0 %2254, %v1118_v33  }
  0x29   : > { %2225 = vmatpush.bf16.msra.mxu1 %v2081_v24  ;;  %2226 = vmatpush.bf16.msra.mxu2 %v2081_v24 }
  0x2a   : > { %834 = vmatpush.bf16.msra.mxu0 %v2081_v24  ;;  %2227 = vmatpush.bf16.msra.mxu3 %v2081_v24  ;;  %v1122_v24 = vld [vmem:[%s2356_s15 + $0x68] sm:$0xff] }
  0x2b   : > { %1185 = vperm.xlu1 %2255, %v1119_v3   ;;  %v442_v3 = vunpack.c.2.s8 %v2481_v7 }
  0x2c   : > { %850 = vmatmul.bf16.vlgmr.msra.gmra.mxu1 %v584_v27  ;;  %865 = vmatmul.bf16.vlgmr.msra.gmra.mxu2 %v593_v28  ;;  %v536_v27 = vcvt.s32.f32 %v464_v17  ;;  %v551_v28 = vcvt.s32.f32 %v479_v18  ;;  %v1123_v18 = vld [vmem:[%s2356_s15 + $0x70] sm:$0xff] }
  0x2d   : > { %965 = vmatpush.bf16.msrb.mxu2 %v2104_v25  ;;  %896 = vmatpush.bf16.msrb.mxu1 %v2096_v26  ;;  %v578_v25 = vpack.c.bf16 %v512_v21, %v509_v20  ;;  %v533_v26 = vcvt.s32.f32 %v461_v16  ;;  %v514_v15 = vcvt.s32.f32 %v442_v3  ;;  %v447_v20 = vunpack.c.1.s8 %v412_v43 }
  0x2e   : > { %835 = vmatmul.bf16.vlgmr.msra.gmra.mxu0 %v575_v57  ;;  %v445_v21 = vunpack.c.2.s8 %v411_v42 }
  0x2f   : > { %v590_v32 = vpack.c.bf16 %v536_v27, %v533_v26 }
  0x30   : > { %1195 = vperm.xlu0 %2254, %v1121_v56   ;;  %v507_v56 = vcvt.s32.f32 %v435_v47  ;;  %v2533_v47 = vld [vmem:[%s2369_s23 + $0x72] sm:$0x3f] }
  0x31   : > { %966 = vmatpush.bf16.msrb.mxu2 %v2103_v29  ;;  %897 = vmatpush.bf16.msrb.mxu1 %v2095_v30  ;;  %v554_v29 = vcvt.s32.f32 %v482_v19  ;;  %v1127_v30 = vld [vmem:[%s2356_s15 + $0x90] sm:$0xff]  ;;  %v444_v19 = vunpack.c.1.s8 %v411_v42 }
  0x33   : > { %1200 = vperm.xlu1 %2255, %v1122_v24   ;;  %v599_v33 = vpack.c.bf16 %v554_v29, %v551_v28  ;;  %v517_v24 = vcvt.s32.f32 %v445_v21  ;;  %v1129_v28 = vld [vmem:[%s2356_s15 + $0xa0] sm:$0xff]  ;;  %v450_v29 = vunpack.c.1.s8 %v2375_v8 }
  0x35   : > { %967 = vmatpush.bf16.msrb.mxu2 %v2102_v37  ;;  %898 = vmatpush.bf16.msrb.mxu1 %v2094_v38  ;;  %v1113_v37 = vld [vmem:[%s2356_s15 + $0x20] sm:$0xff] }
  0x36   : > { %v1125_v38 = vld [vmem:[%s2356_s15 + $0x80] sm:$0xff]  ;;  %1155 = vperm.xlu2 %2256, %v1113_v37   ;;  %v1132_v37 = vld [vmem:[%s2356_s15 + $0xb8] sm:$0xff] }
  0x38   : > { %1210 = vperm.xlu0 %2254, %v1124_v4   ;;  %v1120_v4 = vld [vmem:[%s2356_s15 + $0x58] sm:$0xff] }
  0x39   : > { %968 = vmatpush.bf16.msrb.mxu2 %v2101_v48  ;;  %899 = vmatpush.bf16.msrb.mxu1 %v2093_v49  ;;  %v433_v48 = vunpack.c.2.s8 %v2432_v39  ;;  %v436_v49 = vunpack.c.2.s8 %v2436_v41  ;;  %v1117_v39 = vld [vmem:[%s2356_s15 + $0x40] sm:$0xff]  ;;  %v1131_v41 = vld [vmem:[%s2356_s15 + $0xb0] sm:$0xff] }
  0x3b   : > { %1215 = vperm.xlu1 %2255, %v1125_v38   ;;  %v505_v57 = vcvt.s32.f32 %v433_v48  ;;  %v522_v38 = vcvt.s32.f32 %v450_v29  ;;  %v485_v48 = vunpack.c.0.s8 %v2530_v46 }
  0x3c   : > { %855 = vmatmul.bf16.gmra.mxu1 %v587_v60  ;;  %870 = vmatmul.bf16.gmra.mxu2 %v596_v61  ;;  %v438_v61 = vunpack.c.1.s8 %v2478_v6 }
  0x3d   : > { %969 = vmatpush.bf16.msrb.mxu2 %v2100_v58  ;;  %900 = vmatpush.bf16.msrb.mxu1 %v2092_v59  ;;  %v508_v58 = vcvt.s32.f32 %v436_v49  ;;  %v576_v59 = vpack.c.bf16 %v507_v56, %v504_v55  ;;  %v488_v49 = vunpack.c.0.s8 %v2533_v47  ;;  %v528_v55 = vcvt.s32.f32 %v456_v51 }
  0x3e   : > { %840 = vmatmul.bf16.gmra.mxu0 %v578_v25  ;;  %1160 = vperm.xlu2 %2256, %v1114_v52   ;;  %v459_v52 = vunpack.c.1.s8 %v2417_v34 }
  0x3f   : > { %v577_v60 = vpack.c.bf16 %v508_v58, %v505_v57 }
  0x40   : > { %1225 = vperm.xlu0 %2254, %v1127_v30   ;;  %v453_v30 = vunpack.c.1.s8 %v2378_v9  ;;  %v531_v56 = vcvt.s32.f32 %v459_v52 }
  0x41   : > { %970 = vmatpush.bf16.msrb.mxu2 %v2099_v62  ;;  %901 = vmatpush.bf16.msrb.mxu1 %v2091_v63  ;;  %v441_v62 = vunpack.c.1.s8 %v2481_v7  ;;  %v439_v63 = vunpack.c.2.s8 %v2478_v6  ;;  %v448_v6 = vunpack.c.2.s8 %v412_v43  ;;  %v516_v7 = vcvt.s32.f32 %v444_v19 }
  0x43   : > { %1230 = vperm.xlu1 %2255, %v1128_v53   ;;  %v511_v14 = vcvt.s32.f32 %v439_v63  ;;  %v520_v25 = vcvt.s32.f32 %v448_v6  ;;  %v457_v53 = vunpack.c.2.s8 %v2412_v31  ;;  %v2112_v63 = vld [vmem:[%s2783_s4 + $0x38] sm:$0xff] }
  0x44   : > { %1582 = vmatpush.bf16.msrb.mxu0 %v2112_v63 }
  0x45   : > { %971 = vmatpush.bf16.msrb.mxu2 %v2098_v10  ;;  %902 = vmatpush.bf16.msrb.mxu1 %v2090_v13  ;;  %v510_v10 = vcvt.s32.f32 %v438_v61  ;;  %v513_v13 = vcvt.s32.f32 %v441_v62  ;;  %v580_v17 = vpack.c.bf16 %v514_v15, %v511_v14  ;;  %v583_v27 = vpack.c.bf16 %v520_v25, %v517_v24  ;;  %v2548_v61 = vld [vmem:[%s2369_s23 + $0x7e] sm:$0x3f]  ;;  %v2131_v62 = vld [vmem:[%s2784_s5 + $0x30] sm:$0xff]  ;;  %v2577_v24 = vld [vmem:[%s2369_s23 + $0x84] sm:$0x3f] }
  0x46   : > { %1175 = vperm.xlu2 %2256, %v1117_v39   ;;  %v529_v57 = vcvt.s32.f32 %v457_v53  ;;  %v465_v14 = vunpack.c.1.s8 %v2467_v1  ;;  %v463_v15 = vunpack.c.2.s8 %v2464_v0  ;;  %v2580_v25 = vld [vmem:[%s2369_s23 + $0x8a] sm:$0x3f] }
  0x47   : > { %v579_v16 = vpack.c.bf16 %v513_v13, %v510_v10  ;;  %v462_v13 = vunpack.c.1.s8 %v2464_v0 }
  0x48   : > { %1240 = vperm.xlu0 %2254, %v1130_v40   ;;  %v525_v40 = vcvt.s32.f32 %v453_v30  ;;  %v535_v21 = vcvt.s32.f32 %v463_v15 }
  0x49   : > { %972 = vmatpush.bf16.msrb.mxu2 %v2097_v22  ;;  %903 = vmatpush.bf16.msrb.mxu1 %v2089_v23  ;;  %v1126_v22 = vld [vmem:[%s2356_s15 + $0x88] sm:$0xff]  ;;  %v519_v23 = vcvt.s32.f32 %v447_v20  ;;  %v534_v19 = vcvt.s32.f32 %v462_v13  ;;  %v537_v20 = vcvt.s32.f32 %v465_v14  ;;  %v489_v13 = vunpack.c.1.s8 %v2533_v47 }
  0x4a   : > { %v585_v44 = vpack.c.bf16 %v525_v40, %v522_v38  ;;  %v468_v38 = vunpack.c.1.s8 %v2382_v11  ;;  %v471_v40 = vunpack.c.1.s8 %v2385_v12 }
  0x4b   : > { %1245 = vperm.xlu1 %2255, %v1131_v41   ;;  %v582_v26 = vpack.c.bf16 %v519_v23, %v516_v7  ;;  %v2545_v41 = vld [vmem:[%s2369_s23 + $0x78] sm:$0x3f]  ;;  %v591_v0 = vpack.c.bf16 %v537_v20, %v534_v19  ;;  %v2110_v23 = vld [vmem:[%s2783_s4 + $0x28] sm:$0xff] }
  0x4c   : > { %860 = vmatmul.bf16.gmra.mxu1 %v590_v32  ;;  %875 = vmatmul.bf16.gmra.mxu2 %v599_v33  ;;  %v451_v32 = vunpack.c.2.s8 %v2375_v8  ;;  %v454_v33 = vunpack.c.2.s8 %v2378_v9  ;;  %v557_v8 = vcvt.s32.f32 %v485_v48  ;;  %v560_v9 = vcvt.s32.f32 %v488_v49  ;;  %v2127_v48 = vld [vmem:[%s2784_s5 + $0x10] sm:$0xff] }
  0x4d   : > { %v491_v31 = vunpack.c.0.s8 %v2545_v41  ;;  %v540_v49 = vcvt.s32.f32 %v468_v38 }
  0x4e   : > { %845 = vmatmul.bf16.gmra.mxu0 %v581_v54  ;;  %1190 = vperm.xlu2 %2256, %v1120_v4   ;;  %v523_v42 = vcvt.s32.f32 %v451_v32  ;;  %v526_v43 = vcvt.s32.f32 %v454_v33  ;;  %v602_v50 = vpack.c.bf16 %v560_v9, %v557_v8  ;;  %v460_v54 = vunpack.c.2.s8 %v2417_v34  ;;  %v2128_v33 = vld [vmem:[%s2784_s5 + $0x18] sm:$0xff] }
  0x4f   : > { %v494_v34 = vunpack.c.0.s8 %v2548_v61  ;;  %v563_v3 = vcvt.s32.f32 %v491_v31  ;;  %v543_v8 = vcvt.s32.f32 %v471_v40  ;;  %v492_v40 = vunpack.c.1.s8 %v2545_v41 }
  0x50   : > { %v586_v45 = vpack.c.bf16 %v526_v43, %v523_v42  ;;  %880 = vmatmul.bf16.vlgmr.msra.gmra.mxu3 %v602_v50  ;;  %v532_v58 = vcvt.s32.f32 %v460_v54  ;;  %v469_v42 = vunpack.c.2.s8 %v2382_v11  ;;  %v472_v43 = vunpack.c.2.s8 %v2385_v12  ;;  %v2126_v50 = vld [vmem:[%s2784_s5 + $0x8] sm:$0xff]  ;;  %v2125_v54 = vld [vmem:[%s2784_s5] sm:$0xff] }
  0x51   : > { %v566_v4 = vcvt.s32.f32 %v494_v34  ;;  %v594_v51 = vpack.c.bf16 %v543_v8, %v540_v49  ;;  %v2106_v34 = vld [vmem:[%s2783_s4 + $0x8] sm:$0xff]  ;;  %v564_v49 = vcvt.s32.f32 %v492_v40 }
  0x52   : > { %v589_v39 = vpack.c.bf16 %v532_v58, %v529_v57  ;;  %v541_v11 = vcvt.s32.f32 %v469_v42  ;;  %v544_v9 = vcvt.s32.f32 %v472_v43  ;;  %v474_v58 = vunpack.c.1.s8 %v2420_v35 }
  0x53   : > { %v605_v10 = vpack.c.bf16 %v566_v4, %v563_v3  ;;  %v495_v42 = vunpack.c.1.s8 %v2548_v61  ;;  %v493_v43 = vunpack.c.2.s8 %v2545_v41 }
  0x54   : > { %v595_v52 = vpack.c.bf16 %v544_v9, %v541_v11 }
  0x55   : > { %v567_v8 = vcvt.s32.f32 %v495_v42  ;;  %v565_v11 = vcvt.s32.f32 %v493_v43 }
  0x56   : > { %1205 = vperm.xlu2 %2256, %v1123_v18   ;;  %v2111_v18 = vld [vmem:[%s2783_s4 + $0x30] sm:$0xff] }
  0x57   : > { %1583 = vmatpush.bf16.msrb.mxu0 %v2111_v18  ;;  %v2645_v18 = vcvt.s32.f32 %v489_v13 }
  0x5b   : > { %1584 = vmatpush.bf16.msrb.mxu0 %v2110_v23  ;;  %v483_v23 = vunpack.c.1.s8 %v2475_v5 }
  0x5c   : > { %904 = vmatmul.bf16.vlgmr.msrb.gmra.mxu1 %v576_v59  ;;  %973 = vmatmul.bf16.vlgmr.msrb.gmra.mxu2 %v577_v60  ;;  %v2132_v59 = vld [vmem:[%s2784_s5 + $0x38] sm:$0xff]  ;;  %v588_v60 = vpack.c.bf16 %v531_v56, %v528_v55  ;;  %v2107_v55 = vld [vmem:[%s2783_s4 + $0x10] sm:$0xff]  ;;  %v2113_v56 = vld [vmem:[%s2620_s19] sm:$0xff] }
  0x5d   : > { %1465 = vmatpush.bf16.msrb.mxu3 %v2132_v59  ;;  %v477_v59 = vunpack.c.1.s8 %v2423_v36 }
  0x5e   : > { %1220 = vperm.xlu2 %2256, %v1126_v22  }
  0x5f   : > { %v549_v63 = vcvt.s32.f32 %v477_v59 }
  0x60   : > { %885 = vmatmul.bf16.gmra.mxu3 %v605_v10  ;;  %v486_v10 = vunpack.c.1.s8 %v2530_v46 }
  0x61   : > { %1466 = vmatpush.bf16.msrb.mxu3 %v2131_v62  ;;  %v546_v62 = vcvt.s32.f32 %v474_v58 }
  0x63   : > { %v597_v15 = vpack.c.bf16 %v549_v63, %v546_v62  ;;  %v499_v62 = vunpack.c.2.s8 %v2577_v24  ;;  %v502_v63 = vunpack.c.2.s8 %v2580_v25 }
  0x66   : > { %1235 = vperm.xlu2 %2256, %v1129_v28  }
  0x6c   : > { %909 = vmatmul.bf16.gmra.mxu1 %v579_v16  ;;  %978 = vmatmul.bf16.gmra.mxu2 %v580_v17  ;;  %v466_v16 = vunpack.c.2.s8 %v2467_v1  ;;  %v2130_v17 = vld [vmem:[%s2784_s5 + $0x28] sm:$0xff]  ;;  %v2129_v1 = vld [vmem:[%s2784_s5 + $0x20] sm:$0xff] }
  0x6d   : > { %1467 = vmatpush.bf16.msrb.mxu3 %v2130_v17  ;;  %v2643_v17 = vcvt.s32.f32 %v486_v10 }
  0x6e   : > { %1250 = vperm.xlu2 %2256, %v1132_v37   ;;  %v538_v6 = vcvt.s32.f32 %v466_v16  ;;  %v2109_v37 = vld [vmem:[%s2783_s4 + $0x20] sm:$0xff] }
  0x6f   : > { %1585 = vmatpush.bf16.msrb.mxu0 %v2109_v37 }
  0x70   : > { %v592_v22 = vpack.c.bf16 %v538_v6, %v535_v21 }
  0x71   : > { %1468 = vmatpush.bf16.msrb.mxu3 %v2129_v1  ;;  %v480_v1 = vunpack.c.1.s8 %v2470_v2 }
  0x75   : > { %1469 = vmatpush.bf16.msrb.mxu3 %v2128_v33  ;;  %v555_v33 = vcvt.s32.f32 %v483_v23 }
  0x79   : > { %1470 = vmatpush.bf16.msrb.mxu3 %v2127_v48 }
  0x7c   : > { %914 = vmatmul.bf16.gmra.mxu1 %v582_v26  ;;  %983 = vmatmul.bf16.gmra.mxu2 %v583_v27  ;;  %v497_v26 = vunpack.c.0.s8 %v2577_v24  ;;  %v500_v27 = vunpack.c.0.s8 %v2580_v25 }
  0x7d   : > { %1471 = vmatpush.bf16.msrb.mxu3 %v2126_v50 }
  0x7e   : > { %v569_v28 = vcvt.s32.f32 %v497_v26  ;;  %v572_v29 = vcvt.s32.f32 %v500_v27  ;;  %v481_v26 = vunpack.c.2.s8 %v2470_v2  ;;  %v484_v27 = vunpack.c.2.s8 %v2475_v5 }
  0x80   : > { %v608_v32 = vpack.c.bf16 %v572_v29, %v569_v28  ;;  %v553_v37 = vcvt.s32.f32 %v481_v26  ;;  %v556_v38 = vcvt.s32.f32 %v484_v27 }
  0x81   : > { %1472 = vmatpush.bf16.msrb.mxu3 %v2125_v54 }
  0x82   : > { %890 = vmatmul.bf16.gmra.mxu3 %v608_v32  ;;  %v552_v32 = vcvt.s32.f32 %v480_v1  ;;  %v601_v48 = vpack.c.bf16 %v556_v38, %v553_v37 }
  0x84   : > { %v600_v5 = vpack.c.bf16 %v555_v33, %v552_v32 }
  0x8c   : > { %919 = vmatmul.bf16.gmra.mxu1 %v585_v44  ;;  %988 = vmatmul.bf16.gmra.mxu2 %v586_v45  ;;  %v2108_v45 = vld [vmem:[%s2783_s4 + $0x18] sm:$0xff] }
  0x8d   : > { %1586 = vmatpush.bf16.msrb.mxu0 %v2108_v45  ;;  %v496_v45 = vunpack.c.2.s8 %v2548_v61 }
  0x8f   : > { %v568_v9 = vcvt.s32.f32 %v496_v45  ;;  %v2117_v45 = vld [vmem:[%s2620_s19 + $0x20] sm:$0xff] }
  0x91   : > { %1587 = vmatpush.bf16.msrb.mxu0 %v2107_v55  ;;  %v2115_v55 = vld [vmem:[%s2620_s19 + $0x10] sm:$0xff] }
  0x92   : > { %1473 = vmatmul.bf16.vlgmr.msrb.gmra.mxu3 %v2113_v56  ;;  %v1136_v56 = vpop.permute.xlu0 %1135 }
  0x95   : > { %1588 = vmatpush.bf16.msrb.mxu0 %v2106_v34  ;;  %v501_v34 = vunpack.c.1.s8 %v2580_v25  ;;  %v1146_v25 = vpop.permute.xlu1 %1145 }
  0x9c   : > { %924 = vmatmul.bf16.gmra.mxu1 %v588_v60  ;;  %993 = vmatmul.bf16.gmra.mxu2 %v589_v39  ;;  %v475_v60 = vunpack.c.2.s8 %v2420_v35  ;;  %v478_v39 = vunpack.c.2.s8 %v2423_v36  ;;  %v487_v35 = vunpack.c.2.s8 %v2530_v46  ;;  %v490_v36 = vunpack.c.2.s8 %v2533_v47  ;;  %v2105_v46 = vld [vmem:[%s2783_s4] sm:$0xff] }
  0x9d   : > { %v603_v47 = vpack.c.bf16 %v2645_v18, %v2643_v17  ;;  %1589 = vmatpush.bf16.msrb.mxu0 %v2105_v46  ;;  %v574_v17 = vcvt.s32.f32 %v502_v63  ;;  %v1151_v38 = vpop.permute.xlu1 %1150 }
  0x9e   : > { %v547_v3 = vcvt.s32.f32 %v475_v60  ;;  %v550_v4 = vcvt.s32.f32 %v478_v39  ;;  %v2647_v19 = vcvt.s32.f32 %v487_v35  ;;  %v2649_v20 = vcvt.s32.f32 %v490_v36 }
  0x9f   : > { %v498_v39 = vunpack.c.1.s8 %v2577_v24  ;;  %v573_v35 = vcvt.s32.f32 %v501_v34  ;;  %v571_v36 = vcvt.s32.f32 %v499_v62  ;;  %v2116_v24 = vld [vmem:[%s2620_s19 + $0x18] sm:$0xff] }
  0xa0   : > { %v598_v16 = vpack.c.bf16 %v550_v4, %v547_v3  ;;  %v604_v6 = vpack.c.bf16 %v2649_v20, %v2647_v19 }
  0xa1   : > { %v570_v13 = vcvt.s32.f32 %v498_v39  ;;  %v610_v46 = vpack.c.bf16 %v574_v17, %v571_v36 }
  0xa3   : > { %v609_v20 = vpack.c.bf16 %v573_v35, %v570_v13 }
  0xa5   : > { %v1171_v13 = vpop.permute.xlu1 %1170 }
  0xa9   : > { %v2568_v7 = vpop.f32.mrf.mxu1 }
  0xab   : > { %v836_v29 = vpop.f32.mrf.mxu0 }
  0xac   : > { %929 = vmatmul.bf16.gmra.mxu1 %v591_v0  ;;  %998 = vmatmul.bf16.gmra.mxu2 %v592_v22  ;;  %v2114_v0 = vld [vmem:[%s2620_s19 + $0x8] sm:$0xff] }
  0xad   : > { %1478 = vmatmul.bf16.gmra.mxu3 %v2114_v0 }
  0xaf   : > { %v2584_v30 = vpop.f32.mrf.mxu2 }
  0xb1   : > { %v2596_v44 = vpop.f32.mrf.mxu1 }
  0xb3   : > { %v838_v54 = vpop.f32.mrf.mxu0 }
  0xb7   : > { %v2604_v12 = vpop.f32.mrf.mxu2 }
  0xb9   : > { %v2610_v53 = vpop.f32.mrf.mxu1 }
  0xbb   : > { %v841_v3 = vpop.f32.mrf.mxu0 }
  0xbc   : > { %934 = vmatmul.bf16.gmra.mxu1 %v594_v51  ;;  %1003 = vmatmul.bf16.gmra.mxu2 %v595_v52  ;;  %v606_v51 = vpack.c.bf16 %v567_v8, %v564_v49  ;;  %v607_v52 = vpack.c.bf16 %v568_v9, %v565_v11 }
  0xbd   : > { %1483 = vmatmul.bf16.gmra.mxu3 %v2115_v55 }
  0xbf   : > { %v2626_v57 = vpop.f32.mrf.mxu2 }
  0xc1   : > { %v2632_v31 = vpop.f32.mrf.mxu1 }
  0xc3   : > { %v843_v23 = vpop.f32.mrf.mxu0 }
  0xc7   : > { %v2641_v14 = vpop.f32.mrf.mxu2 }
  0xc9   : > { %v2651_v21 = vpop.f32.mrf.mxu1 }
  0xcc   : > { %939 = vmatmul.bf16.gmra.mxu1 %v597_v15  ;;  %1008 = vmatmul.bf16.gmra.mxu2 %v598_v16  ;;  %v1141_v15 = vpop.permute.xlu0 %1140 }
  0xcd   : > { %1488 = vmatmul.bf16.gmra.mxu3 %v2116_v24 }
  0xcf   : > { %v2661_v22 = vpop.f32.mrf.mxu2 }
  0xd1   : > { %v2667_v28 = vpop.f32.mrf.mxu1 }
  0xd3   : > { %v2683_v39 = vpop.f32.mrf.mxu3 }
  0xd7   : > { %v2673_v2 = vpop.f32.mrf.mxu2 }
  0xd9   : > { %v905_v50 = vpop.f32.mrf.mxu1 }
  0xda   : > { %v906_v41 = vadd.f32 %v905_v50, %v836_v29 }
  0xdc   : > { %944 = vmatmul.bf16.gmra.mxu1 %v600_v5  ;;  %1013 = vmatmul.bf16.gmra.mxu2 %v601_v48  ;;  %v1156_v5 = vpop.permute.xlu2 %1155 }
  0xdd   : > { %1493 = vmatmul.bf16.gmra.mxu3 %v2117_v45 }
  0xdf   : > { %v974_v58 = vpop.f32.mrf.mxu2 }
  0xe0   : > { %v975_v61 = vadd.f32 %v974_v58, %v906_v41 }
  0xe1   : > { %v907_v59 = vpop.f32.mrf.mxu1 }
  0xe2   : > { %v908_v60 = vadd.f32 %v907_v59, %v838_v54  ;;  %v1253_v18 = vmul.f32 %v1136_v56, %v975_v61 }
  0xe4   : > { %v1161_v56 = vpop.permute.xlu2 %1160 }
  0xe7   : > { %v976_v4 = vpop.f32.mrf.mxu2 }
  0xe8   : > { %v977_v10 = vadd.f32 %v976_v4, %v908_v60  ;;  %v1166_v4 = vpop.permute.xlu0 %1165 }
  0xe9   : > { %v910_v16 = vpop.f32.mrf.mxu1 }
  0xea   : > { %v1254_v19 = vmul.f32 %v1141_v15, %v977_v10  ;;  %v911_v27 = vadd.f32 %v910_v16, %v841_v3  ;;  %v2687_v16 = vpop.f32.mrf.mxu3 }
  0xec   : > { %949 = vmatmul.bf16.gmra.mxu1 %v603_v47  ;;  %1018 = vmatmul.bf16.gmra.mxu2 %v604_v6  ;;  %v1277_v0 = vpack.c.bf16 %v1254_v19, %v1253_v18  ;;  %v846_v47 = vpop.f32.mrf.mxu0  ;;  %v2119_v18 = vld [vmem:[%s2620_s19 + $0x30] sm:$0xff] }
  0xee   : > { %1590 = vmatmul.bf16.vlgmr.msrb.gmra.mxu0 %v1277_v0 }
  0xef   : > { %v979_v1 = vpop.f32.mrf.mxu2 }
  0xf0   : > { %v980_v29 = vadd.f32 %v979_v1, %v911_v27 }
  0xf1   : > { %v912_v26 = vpop.f32.mrf.mxu1 }
  0xf2   : > { %v913_v32 = vadd.f32 %v912_v26, %v843_v23  ;;  %v1255_v42 = vmul.f32 %v1146_v25, %v980_v29  ;;  %v1181_v25 = vpop.permute.xlu0 %1180  ;;  %v1176_v23 = vpop.permute.xlu2 %1175 }
  0xf4   : > { %v848_v11 = vpop.f32.mrf.mxu0 }
  0xf7   : > { %v981_v33 = vpop.f32.mrf.mxu2 }
  0xf8   : > { %v982_v37 = vadd.f32 %v981_v33, %v913_v32 }
  0xf9   : > { %v915_v40 = vpop.f32.mrf.mxu1 }
  0xfa   : > { %v1256_v43 = vmul.f32 %v1151_v38, %v982_v37  ;;  %v916_v8 = vadd.f32 %v915_v40, %v846_v47  ;;  %v2120_v37 = vld [vmem:[%s2620_s19 + $0x38] sm:$0xff] }
  0xfc   : > { %954 = vmatmul.bf16.gmra.mxu1 %v606_v51  ;;  %1023 = vmatmul.bf16.gmra.mxu2 %v607_v52  ;;  %v1278_v6 = vpack.c.bf16 %v1256_v43, %v1255_v42  ;;  %v2118_v52 = vld [vmem:[%s2620_s19 + $0x28] sm:$0xff] }
  0xfd   : > { %1498 = vmatmul.bf16.gmra.mxu3 %v2118_v52 }
  0xfe   : > { %1595 = vmatmul.bf16.gmra.mxu0 %v1278_v6  ;;  %v1186_v6 = vpop.permute.xlu1 %1185 }
  0xff   : > { %v984_v48 = vpop.f32.mrf.mxu2 }
 0x100   : > { %v985_v9 = vadd.f32 %v984_v48, %v916_v8 }
 0x101   : > { %v917_v49 = vpop.f32.mrf.mxu1 }
 0x102   : > { %v918_v50 = vadd.f32 %v917_v49, %v848_v11  ;;  %v1257_v41 = vmul.f32 %v1156_v5, %v985_v9  ;;  %v1191_v5 = vpop.permute.xlu2 %1190 }
 0x106   : > { %v1201_v52 = vpop.permute.xlu1 %1200 }
 0x107   : > { %v986_v54 = vpop.f32.mrf.mxu2 }
 0x108   : > { %v987_v55 = vadd.f32 %v986_v54, %v918_v50  ;;  %v2121_v50 = vld [vmem:[%s2620_s19 + $0x40] sm:$0xff] }
 0x109   : > { %v920_v58 = vpop.f32.mrf.mxu1 }
 0x10a   : > { %v1258_v59 = vmul.f32 %v1161_v56, %v987_v55  ;;  %v921_v34 = vadd.f32 %v920_v58, %v2568_v7  ;;  %v2690_v7 = vpop.f32.mrf.mxu3 }
 0x10c   : > { %959 = vmatmul.bf16.gmra.mxu1 %v609_v20  ;;  %1028 = vmatmul.bf16.gmra.mxu2 %v610_v46  ;;  %v1279_v51 = vpack.c.bf16 %v1258_v59, %v1257_v41  ;;  %v1196_v59 = vpop.permute.xlu0 %1195 }
 0x10d   : > { %1503 = vmatmul.bf16.gmra.mxu3 %v2119_v18  ;;  %v1206_v18 = vpop.permute.xlu2 %1205 }
 0x10e   : > { %1600 = vmatmul.bf16.gmra.mxu0 %v1279_v51 }
 0x10f   : > { %v989_v61 = vpop.f32.mrf.mxu2 }
 0x110   : > { %v990_v62 = vadd.f32 %v989_v61, %v921_v34 }
 0x111   : > { %v922_v60 = vpop.f32.mrf.mxu1 }
 0x112   : > { %v923_v63 = vadd.f32 %v922_v60, %v2596_v44  ;;  %v1259_v36 = vmul.f32 %v1166_v4, %v990_v62  ;;  %v2694_v32 = vpop.f32.mrf.mxu3 }
 0x117   : > { %v991_v3 = vpop.f32.mrf.mxu2 }
 0x118   : > { %v992_v10 = vadd.f32 %v991_v3, %v923_v63  ;;  %v2122_v3 = vld [vmem:[%s2620_s19 + $0x48] sm:$0xff] }
 0x119   : > { %v925_v35 = vpop.f32.mrf.mxu1 }
 0x11a   : > { %v1260_v15 = vmul.f32 %v1171_v13, %v992_v10  ;;  %v926_v44 = vadd.f32 %v925_v35, %v2610_v53  ;;  %v2698_v42 = vpop.f32.mrf.mxu3 }
 0x11c   : > { %v1280_v17 = vpack.c.bf16 %v1260_v15, %v1259_v36  ;;  %v1211_v15 = vpop.permute.xlu0 %1210 }
 0x11d   : > { %1508 = vmatmul.bf16.gmra.mxu3 %v2120_v37  ;;  %v1221_v37 = vpop.permute.xlu2 %1220 }
 0x11e   : > { %1605 = vmatmul.bf16.gmra.mxu0 %v1280_v17 }
 0x11f   : > { %v994_v19 = vpop.f32.mrf.mxu2 }
 0x120   : > { %v995_v46 = vadd.f32 %v994_v19, %v926_v44 }
 0x121   : > { %v927_v20 = vpop.f32.mrf.mxu1 }
 0x122   : > { %v928_v0 = vadd.f32 %v927_v20, %v2632_v31  ;;  %v1261_v27 = vmul.f32 %v1176_v23, %v995_v46  ;;  %v2701_v9 = vpop.f32.mrf.mxu3 }
 0x127   : > { %v996_v24 = vpop.f32.mrf.mxu2 }
 0x128   : > { %v997_v1 = vadd.f32 %v996_v24, %v928_v0  ;;  %v2123_v24 = vld [vmem:[%s2620_s19 + $0x50] sm:$0xff] }
 0x129   : > { %v930_v26 = vpop.f32.mrf.mxu1 }
 0x12a   : > { %v1262_v29 = vmul.f32 %v1181_v25, %v997_v1  ;;  %v931_v53 = vadd.f32 %v930_v26, %v2651_v21  ;;  %v1474_v56 = vpop.f32.mrf.mxu3 }
 0x12c   : > { %v1281_v33 = vpack.c.bf16 %v1262_v29, %v1261_v27  ;;  %v1216_v29 = vpop.permute.xlu1 %1215 }
 0x12d   : > { %1513 = vmatmul.bf16.gmra.mxu3 %v2121_v50 }
 0x12e   : > { %1610 = vmatmul.bf16.gmra.mxu0 %v1281_v33 }
 0x12f   : > { %v999_v38 = vpop.f32.mrf.mxu2 }
 0x130   : > { %v1000_v31 = vadd.f32 %v999_v38, %v931_v53 }
 0x131   : > { %v932_v40 = vpop.f32.mrf.mxu1 }
 0x132   : > { %v933_v43 = vadd.f32 %v932_v40, %v2667_v28  ;;  %v1263_v49 = vmul.f32 %v1186_v6, %v1000_v31  ;;  %v1476_v63 = vpop.f32.mrf.mxu3 }
 0x137   : > { %v1001_v47 = vpop.f32.mrf.mxu2 }
 0x138   : > { %v1002_v45 = vadd.f32 %v1001_v47, %v933_v43  ;;  %v2124_v47 = vld [vmem:[%s2620_s19 + $0x58] sm:$0xff] }
 0x139   : > { %v935_v48 = vpop.f32.mrf.mxu1 }
 0x13a   : > { %v1264_v8 = vmul.f32 %v1191_v5, %v1002_v45  ;;  %v936_v21 = vadd.f32 %v935_v48, %v2584_v30  ;;  %v1479_v13 = vpop.f32.mrf.mxu3 }
 0x13c   : > { %v1282_v11 = vpack.c.bf16 %v1264_v8, %v1263_v49 }
 0x13d   : > { %1518 = vmatmul.bf16.gmra.mxu3 %v2122_v3 }
 0x13e   : > { %1615 = vmatmul.bf16.gmra.mxu0 %v1282_v11 }
 0x13f   : > { %v1004_v54 = vpop.f32.mrf.mxu2 }
 0x140   : > { %v1005_v28 = vadd.f32 %v1004_v54, %v936_v21 }
 0x141   : > { %v937_v55 = vpop.f32.mrf.mxu1 }
 0x142   : > { %v938_v58 = vadd.f32 %v937_v55, %v2604_v12  ;;  %v1265_v60 = vmul.f32 %v1196_v59, %v1005_v28  ;;  %v1481_v0 = vpop.f32.mrf.mxu3  ;;  %v1231_v28 = vpop.permute.xlu1 %1230 }
 0x147   : > { %v1006_v41 = vpop.f32.mrf.mxu2 }
 0x148   : > { %v1007_v51 = vadd.f32 %v1006_v41, %v938_v58 }
 0x149   : > { %v940_v61 = vpop.f32.mrf.mxu1 }
 0x14a   : > { %v1266_v34 = vmul.f32 %v1201_v52, %v1007_v51  ;;  %v941_v30 = vadd.f32 %v940_v61, %v2626_v57  ;;  %v2711_v23 = vpop.f32.mrf.mxu3 }
 0x14c   : > { %v1283_v62 = vpack.c.bf16 %v1266_v34, %v1265_v60 }
 0x14d   : > { %1523 = vmatmul.bf16.gmra.mxu3 %v2123_v24 }
 0x14e   : > { %1620 = vmatmul.bf16.gmra.mxu0 %v1283_v62 }
 0x14f   : > { %v1009_v4 = vpop.f32.mrf.mxu2 }
 0x150   : > { %v1010_v35 = vadd.f32 %v1009_v4, %v941_v30 }
 0x151   : > { %v942_v10 = vpop.f32.mrf.mxu1 }
 0x152   : > { %v943_v12 = vadd.f32 %v942_v10, %v2641_v14  ;;  %v1267_v20 = vmul.f32 %v1206_v18, %v1010_v35  ;;  %v1486_v45 = vpop.f32.mrf.mxu3 }
 0x157   : > { %v1011_v36 = vpop.f32.mrf.mxu2 }
 0x158   : > { %v1012_v17 = vadd.f32 %v1011_v36, %v943_v12 }
 0x159   : > { %v945_v19 = vpop.f32.mrf.mxu1 }
 0x15a   : > { %v1268_v44 = vmul.f32 %v1211_v15, %v1012_v17  ;;  %v946_v57 = vadd.f32 %v945_v19, %v2661_v22  ;;  %v2718_v22 = vld [vmem:[%s2785_s6] ss:$0 sm:$0xff]  ;;  %v1489_v51 = vpop.f32.mrf.mxu3 }
 0x15c   : > { %v1284_v46 = vpack.c.bf16 %v1268_v44, %v1267_v20 }
 0x15d   : > { %1528 = vmatmul.bf16.gmra.mxu3 %v2124_v47 }
 0x15e   : > { %1625 = vmatmul.bf16.gmra.mxu0 %v1284_v46 }
 0x15f   : > { %v1014_v25 = vpop.f32.mrf.mxu2 }
 0x160   : > { %v1015_v14 = vadd.f32 %v1014_v25, %v946_v57 }
 0x161   : > { %v947_v1 = vpop.f32.mrf.mxu1 }
 0x162   : > { %v948_v26 = vadd.f32 %v947_v1, %v2673_v2  ;;  %v1269_v40 = vmul.f32 %v1216_v29, %v1015_v14  ;;  %v1491_v10 = vpop.f32.mrf.mxu3 }
 0x167   : > { %v1016_v27 = vpop.f32.mrf.mxu2 }
 0x168   : > { %v1017_v33 = vadd.f32 %v1016_v27, %v948_v26 }
 0x169   : > { %v950_v38 = vpop.f32.mrf.mxu1 }
 0x16a   : > { %v1270_v53 = vmul.f32 %v1221_v37, %v1017_v33  ;;  %v951_v49 = vadd.f32 %v950_v38, %v2683_v39  ;;  %v1494_v26 = vpop.f32.mrf.mxu3 }
 0x16b   : > { %v1591_v31 = vpop.f32.mrf.mxu0 }
 0x16c   : > { %v1285_v43 = vpack.c.bf16 %v1270_v53, %v1269_v40  ;;  %v1592_v5 = vadd.f32 %v1591_v31, %v1474_v56  ;;  %v1226_v56 = vpop.permute.xlu0 %1225 }
 0x16e   : > { %1630 = vmatmul.bf16.gmra.mxu0 %v1285_v43  ;;  %v1655_v8 = vadd.f32 %v2718_v22, %v1592_v5 }
 0x16f   : > { %v1019_v6 = vpop.f32.mrf.mxu2 }
 0x170   : > { %v1020_v50 = vadd.f32 %v1019_v6, %v951_v49  ;;  %v1679_v58 = vmax.f32 %v1655_v8, 0.0 }
 0x171   : > { %v952_v2 = vpop.f32.mrf.mxu1 }
 0x172   : > { %v953_v54 = vadd.f32 %v952_v2, %v2687_v16  ;;  %v1271_v52 = vmul.f32 %v1226_v56, %v1020_v50  ;;  %v1496_v47 = vpop.f32.mrf.mxu3 }
 0x173   : > { %v1593_v48 = vpop.f32.mrf.mxu0 }
 0x174   : > { %v1594_v11 = vadd.f32 %v1593_v48, %v1476_v63  ;;  %v1241_v19 = vpop.permute.xlu0 %1240  ;;  %v1246_v48 = vpop.permute.xlu1 %1245 }
 0x176   : > { %v1656_v55 = vadd.f32 %v2718_v22, %v1594_v11 }
 0x177   : > { %v1021_v21 = vpop.f32.mrf.mxu2 }
 0x178   : > { %v1680_v41 = vmax.f32 %v1656_v55, 0.0  ;;  %v1022_v59 = vadd.f32 %v1021_v21, %v953_v54 }
 0x179   : > { %v955_v39 = vpop.f32.mrf.mxu1 }
 0x17a   : > { %v2136_v61 = vpack.c.bf16 %v1680_v41, %v1679_v58  ;;  %v1272_v16 = vmul.f32 %v1231_v28, %v1022_v59  ;;  %v956_v30 = vadd.f32 %v955_v39, %v2690_v7 }
 0x17b   : > { %v1596_v60 = vpop.f32.mrf.mxu0 }
 0x17c   : > { %2137 = vst [vmem:[%s2729_s10] sm:$0xff] %v2136_v61   ;;  %v1286_v34 = vpack.c.bf16 %v1272_v16, %v1271_v52  ;;  %v1597_v63 = vadd.f32 %v1596_v60, %v1479_v13  ;;  %v1236_v13 = vpop.permute.xlu2 %1235 }
 0x17e   : > { %1635 = vmatmul.bf16.gmra.mxu0 %v1286_v34  ;;  %v1657_v35 = vadd.f32 %v2718_v22, %v1597_v63 }
 0x17f   : > { %v1024_v62 = vpop.f32.mrf.mxu2 }
 0x180   : > { %v1025_v36 = vadd.f32 %v1024_v62, %v956_v30  ;;  %v1681_v20 = vmax.f32 %v1657_v35, 0.0  ;;  %v1499_v54 = vpop.f32.mrf.mxu3 }
 0x181   : > { %v957_v3 = vpop.f32.mrf.mxu1 }
 0x182   : > { %v958_v15 = vadd.f32 %v957_v3, %v2694_v32  ;;  %v1273_v25 = vmul.f32 %v1236_v13, %v1025_v36 }
 0x183   : > { %v1598_v4 = vpop.f32.mrf.mxu0 }
 0x184   : > { %v1599_v12 = vadd.f32 %v1598_v4, %v1481_v0 }
 0x186   : > { %v1658_v17 = vadd.f32 %v2718_v22, %v1599_v12 }
 0x187   : > { %v1026_v18 = vpop.f32.mrf.mxu2 }
 0x188   : > { %v1682_v44 = vmax.f32 %v1658_v17, 0.0  ;;  %v1027_v46 = vadd.f32 %v1026_v18, %v958_v15  ;;  %v1501_v39 = vpop.f32.mrf.mxu3 }
 0x189   : > { %v960_v24 = vpop.f32.mrf.mxu1 }
 0x18a   : > { %v2141_v1 = vpack.c.bf16 %v1682_v44, %v1681_v20  ;;  %v1274_v57 = vmul.f32 %v1241_v19, %v1027_v46  ;;  %v961_v33 = vadd.f32 %v960_v24, %v2698_v42 }
 0x18b   : > { %v1601_v7 = vpop.f32.mrf.mxu0 }
 0x18c   : > { %2193 = vst [vmem:[%s2729_s10 + $0x8] sm:$0xff] %v2141_v1   ;;  %v1287_v14 = vpack.c.bf16 %v1274_v57, %v1273_v25  ;;  %v1602_v32 = vadd.f32 %v1601_v7, %v2711_v23  ;;  %v1251_v23 = vpop.permute.xlu2 %1250 }
 0x18e   : > { %1640 = vmatmul.bf16.gmra.mxu0 %v1287_v14  ;;  %v1659_v37 = vadd.f32 %v2718_v22, %v1602_v32 }
 0x18f   : > { %v1029_v0 = vpop.f32.mrf.mxu2 }
 0x190   : > { %v1030_v40 = vadd.f32 %v1029_v0, %v961_v33  ;;  %v1683_v6 = vmax.f32 %v1659_v37, 0.0 }
 0x191   : > { %v962_v27 = vpop.f32.mrf.mxu1 }
 0x192   : > { %v963_v53 = vadd.f32 %v962_v27, %v2701_v9  ;;  %v1275_v49 = vmul.f32 %v1246_v48, %v1030_v40 }
 0x193   : > { %v1603_v29 = vpop.f32.mrf.mxu0 }
 0x194   : > { %v1604_v38 = vadd.f32 %v1603_v29, %v1486_v45 }
 0x196   : > { %v1660_v31 = vadd.f32 %v2718_v22, %v1604_v38 }
 0x197   : > { %v1031_v43 = vpop.f32.mrf.mxu2 }
 0x198   : > { %v1684_v5 = vmax.f32 %v1660_v31, 0.0  ;;  %v1032_v2 = vadd.f32 %v1031_v43, %v963_v53 }
 0x19a   : > { %v2146_v8 = vpack.c.bf16 %v1684_v5, %v1683_v6  ;;  %v1276_v11 = vmul.f32 %v1251_v23, %v1032_v2 }
 0x19b   : > { %v1606_v42 = vpop.f32.mrf.mxu0 }
 0x19c   : > { %2194 = vst [vmem:[%s2729_s10 + $0x10] sm:$0xff] %v2146_v8   ;;  %v1288_v50 = vpack.c.bf16 %v1276_v11, %v1275_v49  ;;  %v1607_v45 = vadd.f32 %v1606_v42, %v1489_v51  ;;  %v1504_v51 = vpop.f32.mrf.mxu3 }
 0x19e   : > { %1645 = vmatmul.bf16.gmra.mxu0 %v1288_v50  ;;  %v1661_v55 = vadd.f32 %v2718_v22, %v1607_v45 }
 0x1a0   : > { %v1685_v28 = vmax.f32 %v1661_v55, 0.0 }
 0x1a3   : > { %v1608_v9 = vpop.f32.mrf.mxu0 }
 0x1a4   : > { %v1609_v21 = vadd.f32 %v1608_v9, %v1491_v10  ;;  %v1506_v10 = vpop.f32.mrf.mxu3 }
 0x1a6   : > { %v1662_v56 = vadd.f32 %v2718_v22, %v1609_v21 }
 0x1a8   : > { %v1686_v58 = vmax.f32 %v1662_v56, 0.0 }
 0x1aa   : > { %v2151_v41 = vpack.c.bf16 %v1686_v58, %v1685_v28 }
 0x1ab   : > { %v1611_v59 = vpop.f32.mrf.mxu0 }
 0x1ac   : > { %2195 = vst [vmem:[%s2729_s10 + $0x18] sm:$0xff] %v2151_v41   ;;  %v1612_v52 = vadd.f32 %v1611_v59, %v1494_v26  ;;  %v1509_v19 = vpop.f32.mrf.mxu3 }
 0x1ae   : > { %v1663_v16 = vadd.f32 %v2718_v22, %v1612_v52 }
 0x1b0   : > { %v1687_v62 = vmax.f32 %v1663_v16, 0.0 }
 0x1b3   : > { %v1613_v61 = vpop.f32.mrf.mxu0 }
 0x1b4   : > { %v1614_v60 = vadd.f32 %v1613_v61, %v1496_v47  ;;  %v1511_v24 = vpop.f32.mrf.mxu3 }
 0x1b6   : > { %v1664_v34 = vadd.f32 %v2718_v22, %v1614_v60 }
 0x1b8   : > { %v1688_v63 = vmax.f32 %v1664_v34, 0.0 }
 0x1ba   : > { %v2156_v3 = vpack.c.bf16 %v1688_v63, %v1687_v62 }
 0x1bb   : > { %v1616_v4 = vpop.f32.mrf.mxu0 }
 0x1bc   : > { %2196 = vst [vmem:[%s2729_s10 + $0x20] sm:$0xff] %v2156_v3   ;;  %v1617_v30 = vadd.f32 %v1616_v4, %v1499_v54  ;;  %v1514_v32 = vpop.f32.mrf.mxu3 }
 0x1be   : > { %v1665_v12 = vadd.f32 %v2718_v22, %v1617_v30 }
 0x1c0   : > { %v1689_v17 = vmax.f32 %v1665_v12, 0.0 }
 0x1c3   : > { %v1618_v35 = vpop.f32.mrf.mxu0 }
 0x1c4   : > { %v1619_v36 = vadd.f32 %v1618_v35, %v1501_v39  ;;  %v1516_v40 = vpop.f32.mrf.mxu3 }
 0x1c6   : > { %v1666_v15 = vadd.f32 %v2718_v22, %v1619_v36 }
 0x1c8   : > { %v1690_v18 = vmax.f32 %v1666_v15, 0.0 }
 0x1ca   : > { %v2161_v20 = vpack.c.bf16 %v1690_v18, %v1689_v17 }
 0x1cb   : > { %v1621_v44 = vpop.f32.mrf.mxu0 }
 0x1cc   : > { %2197 = vst [vmem:[%s2729_s10 + $0x28] sm:$0xff] %v2161_v20   ;;  %v1622_v46 = vadd.f32 %v1621_v44, %v1504_v51  ;;  %v1519_v5 = vpop.f32.mrf.mxu3 }
 0x1ce   : > { %v1667_v25 = vadd.f32 %v2718_v22, %v1622_v46 }
 0x1d0   : > { %v1691_v7 = vmax.f32 %v1667_v25, 0.0 }
 0x1d3   : > { %v1623_v13 = vpop.f32.mrf.mxu0 }
 0x1d4   : > { %v1624_v1 = vadd.f32 %v1623_v13, %v1506_v10  ;;  %v1521_v50 = vpop.f32.mrf.mxu3 }
 0x1d6   : > { %v1668_v57 = vadd.f32 %v2718_v22, %v1624_v1 }
 0x1d8   : > { %v1692_v14 = vmax.f32 %v1668_v57, 0.0 }
 0x1da   : > { %v2166_v26 = vpack.c.bf16 %v1692_v14, %v1691_v7 }
 0x1db   : > { %v1626_v0 = vpop.f32.mrf.mxu0 }
 0x1dc   : > { %2198 = vst [vmem:[%s2729_s10 + $0x30] sm:$0xff] %v2166_v26   ;;  %v1627_v27 = vadd.f32 %v1626_v0, %v1509_v19  ;;  %v1524_v56 = vpop.f32.mrf.mxu3 }
 0x1de   : > { %v1669_v33 = vadd.f32 %v2718_v22, %v1627_v27 }
 0x1e0   : > { %v1693_v53 = vmax.f32 %v1669_v33, 0.0 }
 0x1e3   : > { %v1628_v29 = vpop.f32.mrf.mxu0 }
 0x1e4   : > { %v1629_v37 = vadd.f32 %v1628_v29, %v1511_v24  ;;  %v1526_v52 = vpop.f32.mrf.mxu3 }
 0x1e6   : > { %v1670_v38 = vadd.f32 %v2718_v22, %v1629_v37 }
 0x1e8   : > { %v1694_v31 = vmax.f32 %v1670_v38, 0.0 }
 0x1ea   : > { %v2171_v43 = vpack.c.bf16 %v1694_v31, %v1693_v53 }
 0x1eb   : > { %v1631_v47 = vpop.f32.mrf.mxu0 }
 0x1ec   : > { %2199 = vst [vmem:[%s2729_s10 + $0x38] sm:$0xff] %v2171_v43   ;;  %v1632_v6 = vadd.f32 %v1631_v47, %v1514_v32  ;;  %v1529_v3 = vpop.f32.mrf.mxu3 }
 0x1ee   : > { %v1671_v48 = vadd.f32 %v2718_v22, %v1632_v6 }
 0x1f0   : > { %v1695_v8 = vmax.f32 %v1671_v48, 0.0 }
 0x1f3   : > { %v1633_v2 = vpop.f32.mrf.mxu0 }
 0x1f4   : > { %v1634_v23 = vadd.f32 %v1633_v2, %v1516_v40  ;;  %v1531_v35 = vpop.f32.mrf.mxu3 }
 0x1f6   : > { %v1672_v49 = vadd.f32 %v2718_v22, %v1634_v23 }
 0x1f8   : > { %v1696_v11 = vmax.f32 %v1672_v49, 0.0 }
 0x1fa   : > { %v2176_v42 = vpack.c.bf16 %v1696_v11, %v1695_v8 }
 0x1fb   : > { %v1636_v45 = vpop.f32.mrf.mxu0 }
 0x1fc   : > { %2200 = vst [vmem:[%s2729_s10 + $0x40] sm:$0xff] %v2176_v42   ;;  %v1637_v54 = vadd.f32 %v1636_v45, %v1519_v5 }
 0x1fe   : > { %v1673_v55 = vadd.f32 %v2718_v22, %v1637_v54 }
 0x200   : > { %v1697_v58 = vmax.f32 %v1673_v55, 0.0 }
 0x203   : > { %v1638_v9 = vpop.f32.mrf.mxu0 }
 0x204   : > { %v1639_v21 = vadd.f32 %v1638_v9, %v1521_v50 }
 0x206   : > { %v1674_v28 = vadd.f32 %v2718_v22, %v1639_v21 }
 0x208   : > { %v1698_v41 = vmax.f32 %v1674_v28, 0.0 }
 0x20a   : > { %v2181_v59 = vpack.c.bf16 %v1698_v41, %v1697_v58 }
 0x20b   : > { %v1641_v39 = vpop.f32.mrf.mxu0 }
 0x20c   : > { %2201 = vst [vmem:[%s2729_s10 + $0x48] sm:$0xff] %v2181_v59   ;;  %v1642_v61 = vadd.f32 %v1641_v39, %v1524_v56 }
 0x20e   : > { %v1675_v60 = vadd.f32 %v2718_v22, %v1642_v61 }
 0x210   : > { %v1699_v62 = vmax.f32 %v1675_v60, 0.0 }
 0x213   : > { %v1643_v16 = vpop.f32.mrf.mxu0 }
 0x214   : > { %v1644_v51 = vadd.f32 %v1643_v16, %v1526_v52 }
 0x216   : > { %v1676_v34 = vadd.f32 %v2718_v22, %v1644_v51 }
 0x218   : > { %v1700_v63 = vmax.f32 %v1676_v34, 0.0 }
 0x21a   : > { %v2186_v4 = vpack.c.bf16 %v1700_v63, %v1699_v62 }
 0x21b   : > { %v1646_v10 = vpop.f32.mrf.mxu0 }
 0x21c   : > { %2202 = vst [vmem:[%s2729_s10 + $0x50] sm:$0xff] %v2186_v4   ;;  %v1647_v30 = vadd.f32 %v1646_v10, %v1529_v3 }
 0x21e   : > { %v1677_v36 = vadd.f32 %v2718_v22, %v1647_v30 }
 0x220   : > { %v1701_v18 = vmax.f32 %v1677_v36, 0.0 }
 0x223   : > { %v1648_v12 = vpop.f32.mrf.mxu0 }
 0x224   : > { %v1649_v15 = vadd.f32 %v1648_v12, %v1531_v35 }
 0x226   : > { %v1678_v17 = vadd.f32 %v2718_v22, %v1649_v15 }
 0x228   : > { %v1702_v19 = vmax.f32 %v1678_v17, 0.0 }
 0x22a   : > { %v2191_v20 = vpack.c.bf16 %v1702_v19, %v1701_v18 }
 0x22c   : > { %2203 = vst [vmem:[%s2729_s10 + $0x58] sm:$0xff] %v2191_v20  }
 0x22d PF: > { %s17_s26 = sadd.s32 1, %s2280_s26   ;;  %s2787_s24 = smov %s2276_s25 }
 0x22e   : > { %p14_p5 = scmp.ge.s32.totalorder %s17_s26, 4   ;;  %s2788_s25 = smov %s2790_s27 }
 0x230   :  { %16 = sbr.rel (!%p14_p5) target bundleno = 2 (0x2), region = 95 }

// kernel: gnn_forward.5
= control target key start
LH: loop header
LB: loop body
LE: loop exit
PB: predicated region body
PF: predicated region fallthrough
CT: control target
= control target key end

     0   :  { %s2204_s24 = smov 0   ;;  %s2206_s25 = smov 0   ;;  %s2669_s0 = inlined_call_operand.vmem [shape: s8[384,384], index: 0, kind: input, shape index: {}]   ;;  %s2670_s1 = inlined_call_operand.vmem [shape: bf16[384,128], index: 1, kind: input, shape index: {}, may-alias: {1,2}]   ;;  %s2671_s2 = inlined_call_operand.vmem [shape: bf16[384,128], index: 2, kind: input, shape index: {}, may-alias: {1,2}]   ;;  %s2672_s3 = inlined_call_operand.vmem [shape: f32[384,1], index: 3, kind: input, shape index: {}]   ;;  %s2673_s4 = inlined_call_operand.vmem [shape: bf16[128,128], index: 4, kind: input, shape index: {}]   ;;  %s2674_s5 = inlined_call_operand.vmem [shape: bf16[128,128], index: 5, kind: input, shape index: {}]   ;;  %s2675_s6 = inlined_call_operand.vmem [shape: f32[1,128], index: 6, kind: input, shape index: {}]   ;;  %s2676_s7 = inlined_call_operand.vmem [shape: f32[384,128], index: 7, kind: output, shape index: {}]  }
   0x1   :  { %s2208_s26 = smov 0  }
   0x2 LB: > { %s29_s27 = sadd.s32 1, %s2157_s25  ;;  %p1818_p0 = scmp.ge.s32.totalorder %s2161_s26, 1  ;;  %s2161_s26 = sphi %s2208_s26, %s17_s26   ;;  %s2157_s25 = sphi %s2206_s25, %s2678_s25   ;;  %s2153_s24 = sphi %s2204_s24, %s2677_s24  }
   0x3   : > { %p31_p1 = scmp.ge.s32.totalorder %s29_s27, 2  ;;  %p291_p2 = scmp.lt.s32.totalorder %s2161_s26, 3 }
   0x5   : > { %s2680_s27 = smov (%p31_p1, %s29_s27), 0  ;;  %p292_p3 = pnand %p1818_p0, %p291_p2 }
   0x6   : > { %s343_s30 = smul.u32 (!%p292_p3), 24, %s2153_s24 }
   0x7   : > { %295 = sbr.rel (%p292_p3) target bundleno = 553 (0x229), region = 48 }
   0x8   : > { %p345_p4 = scmp.lt.s32.totalorder (!%p292_p3), %s343_s30, 47 }
   0xc   : > { %v2040_v0 = vld [vmem:[%s2670_s1 + $0x38] sm:$0xff]  ;;  %v2039_v1 = vld [vmem:[%s2670_s1 + $0x30] sm:$0xff]  ;;  %s2682_s30 = smov (!%p345_p4, %s343_s30), 47  ;;  %v2163_v2 = vmov 0   ;;  %v2038_v3 = vld [vmem:[%s2670_s1 + $0x28] sm:$0xff] }
   0xd   : > { %2085 = vmatpush.bf16.msra.mxu1 %v2040_v0  ;;  %2086 = vmatpush.bf16.msra.mxu2 %v2040_v0  ;;  %s1821_s12 = sshll.u32 %s2682_s30, 3  ;;  %v2037_v5 = vld [vmem:[%s2670_s1 + $0x20] sm:$0xff]  ;;  %s2109_s18 = smul.u32 6, %s2682_s30  ;;  %v2036_v6 = vld [vmem:[%s2670_s1 + $0x18] sm:$0xff]  ;;  %v2035_v7 = vld [vmem:[%s2670_s1 + $0x10] sm:$0xff] }
   0xe   : > { %827 = vmatpush.bf16.msra.mxu0 %v2040_v0  ;;  %2087 = vmatpush.bf16.msra.mxu3 %v2040_v0  ;;  %s2239_s15 = scalar_lea.vmem %s2672_s3, %s1821_s12  ;;  %v2034_v18 = vld [vmem:[%s2670_s1 + $0x8] sm:$0xff]  ;;  %v2033_v24 = vld [vmem:[%s2670_s1] sm:$0xff]  ;;  %v2056_v25 = vld [vmem:[%s2670_s1 + $0xb8] sm:$0xff]  ;;  %s2603_s16 = scalar_lea.vmem %s2676_s7, %s1821_s12 }
   0xf   : > { %2135 = vset.pattern.permute.xlu0 %v2163_v2  ;;  %2136 = vset.pattern.permute.xlu1 %v2163_v2  ;;  %v1109_v4 = vld [vmem:[%s2239_s15] sm:$0xff]  ;;  %s2252_s23 = scalar_lea.vmem %s2669_s0, %s2109_s18  ;;  %v1110_v10 = vld [vmem:[%s2239_s15 + $0x8] sm:$0xff]  ;;  %v1111_v13 = vld [vmem:[%s2239_s15 + $0x10] sm:$0xff]  ;;  %s1820_s18 = sshll.u32 %s2682_s30, 2 }
  0x10   : > { %2137 = vset.pattern.permute.xlu2 %v2163_v2  ;;  %1135 = vperm.xlu0 %2135, %v1109_v4   ;;  %v2258_v8 = vld [vmem:[%s2252_s23 + $0x24] sm:$0x3f]  ;;  %v2261_v9 = vld [vmem:[%s2252_s23 + $0x2a] sm:$0x3f]  ;;  %v1115_v19 = vld [vmem:[%s2239_s15 + $0x30] sm:$0xff]  ;;  %s2501_s24 = scalar_lea.vmem %s2671_s2, %s1820_s18 }
  0x11   : > { %2088 = vmatpush.bf16.msra.mxu1 %v2039_v1  ;;  %2089 = vmatpush.bf16.msra.mxu2 %v2039_v1  ;;  %v2265_v11 = vld [vmem:[%s2252_s23 + $0x48] sm:$0x3f]  ;;  %v2268_v12 = vld [vmem:[%s2252_s23 + $0x4e] sm:$0x3f]  ;;  %v449_v14 = vunpack.c.0.s8 %v2258_v8  ;;  %v452_v15 = vunpack.c.0.s8 %v2261_v9  ;;  %v2048_v26 = vld [vmem:[%s2670_s1 + $0x78] sm:$0xff] }
  0x12   : > { %828 = vmatpush.bf16.msra.mxu0 %v2039_v1  ;;  %2090 = vmatpush.bf16.msra.mxu3 %v2039_v1  ;;  %v467_v16 = vunpack.c.0.s8 %v2265_v11  ;;  %v470_v17 = vunpack.c.0.s8 %v2268_v12  ;;  %v2055_v29 = vld [vmem:[%s2670_s1 + $0xb0] sm:$0xff]  ;;  %v1112_v32 = vld [vmem:[%s2239_s15 + $0x18] sm:$0xff]  ;;  %v1118_v33 = vld [vmem:[%s2239_s15 + $0x48] sm:$0xff] }
  0x13   : > { %1145 = vperm.xlu1 %2136, %v1111_v13   ;;  %v521_v20 = vcvt.s32.f32 %v449_v14  ;;  %v524_v21 = vcvt.s32.f32 %v452_v15  ;;  %v2047_v30 = vld [vmem:[%s2670_s1 + $0x70] sm:$0xff]  ;;  %v2306_v36 = vld [vmem:[%s2252_s23 + $0x5a] sm:$0x3f]  ;;  %v2054_v37 = vld [vmem:[%s2670_s1 + $0xa8] sm:$0xff] }
  0x14   : > { %v539_v22 = vcvt.s32.f32 %v467_v16  ;;  %v542_v23 = vcvt.s32.f32 %v470_v17  ;;  %v2295_v31 = vld [vmem:[%s2252_s23 + $0x30] sm:$0x3f]  ;;  %v2300_v34 = vld [vmem:[%s2252_s23 + $0x36] sm:$0x3f]  ;;  %v2046_v38 = vld [vmem:[%s2670_s1 + $0x68] sm:$0xff]  ;;  %v476_v45 = vunpack.c.0.s8 %v2306_v36 }
  0x15   : > { %2091 = vmatpush.bf16.msra.mxu1 %v2038_v3  ;;  %2092 = vmatpush.bf16.msra.mxu2 %v2038_v3  ;;  %v584_v27 = vpack.c.bf16 %v524_v21, %v521_v20  ;;  %v2303_v35 = vld [vmem:[%s2252_s23 + $0x54] sm:$0x3f]  ;;  %v2315_v39 = vld [vmem:[%s2252_s23] sm:$0x3f]  ;;  %v455_v40 = vunpack.c.0.s8 %v2295_v31  ;;  %v2319_v41 = vld [vmem:[%s2252_s23 + $0x6] sm:$0x3f]  ;;  %v458_v43 = vunpack.c.0.s8 %v2300_v34 }
  0x16   : > { %829 = vmatpush.bf16.msra.mxu0 %v2038_v3  ;;  %2093 = vmatpush.bf16.msra.mxu3 %v2038_v3  ;;  %v593_v28 = vpack.c.bf16 %v542_v23, %v539_v22  ;;  %v431_v42 = vunpack.c.0.s8 %v2315_v39  ;;  %v473_v44 = vunpack.c.0.s8 %v2303_v35  ;;  %v434_v46 = vunpack.c.0.s8 %v2319_v41  ;;  %v2053_v48 = vld [vmem:[%s2670_s1 + $0xa0] sm:$0xff]  ;;  %v1116_v50 = vld [vmem:[%s2239_s15 + $0x38] sm:$0xff]  ;;  %v2051_v62 = vld [vmem:[%s2670_s1 + $0x90] sm:$0xff] }
  0x17   : > { %v2045_v49 = vld [vmem:[%s2670_s1 + $0x60] sm:$0xff]  ;;  %v527_v52 = vcvt.s32.f32 %v455_v40  ;;  %v530_v53 = vcvt.s32.f32 %v458_v43  ;;  %v548_v55 = vcvt.s32.f32 %v476_v45  ;;  %v2052_v58 = vld [vmem:[%s2670_s1 + $0x98] sm:$0xff]  ;;  %v2043_v63 = vld [vmem:[%s2670_s1 + $0x50] sm:$0xff]  ;;  %v432_v45 = vunpack.c.1.s8 %v2315_v39 }
  0x18   : > { %1140 = vperm.xlu0 %2135, %v1110_v10   ;;  %v503_v47 = vcvt.s32.f32 %v431_v42  ;;  %v506_v51 = vcvt.s32.f32 %v434_v46  ;;  %v545_v54 = vcvt.s32.f32 %v473_v44  ;;  %v1121_v56 = vld [vmem:[%s2239_s15 + $0x60] sm:$0xff]  ;;  %v2044_v59 = vld [vmem:[%s2670_s1 + $0x58] sm:$0xff]  ;;  %v1119_v3 = vld [vmem:[%s2239_s15 + $0x50] sm:$0xff] }
  0x19   : > { %2094 = vmatpush.bf16.msra.mxu1 %v2037_v5  ;;  %2095 = vmatpush.bf16.msra.mxu2 %v2037_v5  ;;  %v587_v60 = vpack.c.bf16 %v530_v53, %v527_v52  ;;  %v2347_v0 = vld [vmem:[%s2252_s23 + $0x3c] sm:$0x3f]  ;;  %v2350_v1 = vld [vmem:[%s2252_s23 + $0x42] sm:$0x3f]  ;;  %v2050_v10 = vld [vmem:[%s2670_s1 + $0x88] sm:$0xff] }
  0x1a   : > { %830 = vmatpush.bf16.msra.mxu0 %v2037_v5  ;;  %2096 = vmatpush.bf16.msra.mxu3 %v2037_v5  ;;  %v575_v57 = vpack.c.bf16 %v506_v51, %v503_v47  ;;  %v596_v61 = vpack.c.bf16 %v548_v55, %v545_v54  ;;  %v2353_v2 = vld [vmem:[%s2252_s23 + $0x60] sm:$0x3f]  ;;  %v1124_v4 = vld [vmem:[%s2239_s15 + $0x78] sm:$0xff]  ;;  %v2358_v5 = vld [vmem:[%s2252_s23 + $0x66] sm:$0x3f]  ;;  %v461_v16 = vunpack.c.0.s8 %v2347_v0  ;;  %v464_v17 = vunpack.c.0.s8 %v2350_v1 }
  0x1b   : > { %1150 = vperm.xlu1 %2136, %v1112_v32   ;;  %v2042_v13 = vld [vmem:[%s2670_s1 + $0x48] sm:$0xff]  ;;  %v2049_v22 = vld [vmem:[%s2670_s1 + $0x80] sm:$0xff]  ;;  %v411_v42 = vld [vmem:[%s2252_s23 + $0x18] sm:$0x3f]  ;;  %v435_v47 = vunpack.c.1.s8 %v2319_v41  ;;  %v504_v55 = vcvt.s32.f32 %v432_v45 }
  0x1c   : > { %v2041_v23 = vld [vmem:[%s2670_s1 + $0x40] sm:$0xff]  ;;  %v1130_v40 = vld [vmem:[%s2239_s15 + $0xa8] sm:$0xff]  ;;  %v443_v44 = vunpack.c.0.s8 %v411_v42  ;;  %v1128_v53 = vld [vmem:[%s2239_s15 + $0x98] sm:$0xff] }
  0x1d   : > { %2097 = vmatpush.bf16.msra.mxu1 %v2036_v6  ;;  %2098 = vmatpush.bf16.msra.mxu2 %v2036_v6  ;;  %v412_v43 = vld [vmem:[%s2252_s23 + $0x1e] sm:$0x3f]  ;;  %v1114_v52 = vld [vmem:[%s2239_s15 + $0x28] sm:$0xff] }
  0x1e   : > { %831 = vmatpush.bf16.msra.mxu0 %v2036_v6  ;;  %2099 = vmatpush.bf16.msra.mxu3 %v2036_v6  ;;  %v2361_v6 = vld [vmem:[%s2252_s23 + $0xc] sm:$0x3f]  ;;  %v446_v46 = vunpack.c.0.s8 %v412_v43 }
  0x1f   : > { %v437_v14 = vunpack.c.0.s8 %v2361_v6 }
  0x20   : > { %1165 = vperm.xlu0 %2135, %v1115_v19   ;;  %v482_v19 = vunpack.c.0.s8 %v2358_v5  ;;  %v518_v51 = vcvt.s32.f32 %v446_v46  ;;  %v2413_v46 = vld [vmem:[%s2252_s23 + $0x6c] sm:$0x3f] }
  0x21   : > { %2100 = vmatpush.bf16.msra.mxu1 %v2035_v7  ;;  %2101 = vmatpush.bf16.msra.mxu2 %v2035_v7  ;;  %v509_v20 = vcvt.s32.f32 %v437_v14 }
  0x22   : > { %832 = vmatpush.bf16.msra.mxu0 %v2035_v7  ;;  %2102 = vmatpush.bf16.msra.mxu3 %v2035_v7  ;;  %v2364_v7 = vld [vmem:[%s2252_s23 + $0x12] sm:$0x3f] }
  0x23   : > { %1170 = vperm.xlu1 %2136, %v1116_v50   ;;  %v440_v15 = vunpack.c.0.s8 %v2364_v7  ;;  %v515_v50 = vcvt.s32.f32 %v443_v44 }
  0x25   : > { %2103 = vmatpush.bf16.msra.mxu1 %v2034_v18  ;;  %2104 = vmatpush.bf16.msra.mxu2 %v2034_v18  ;;  %v512_v21 = vcvt.s32.f32 %v440_v15  ;;  %v581_v54 = vpack.c.bf16 %v518_v51, %v515_v50  ;;  %v456_v51 = vunpack.c.1.s8 %v2295_v31 }
  0x26   : > { %833 = vmatpush.bf16.msra.mxu0 %v2034_v18  ;;  %2105 = vmatpush.bf16.msra.mxu3 %v2034_v18  ;;  %v479_v18 = vunpack.c.0.s8 %v2353_v2 }
  0x28   : > { %1180 = vperm.xlu0 %2135, %v1118_v33  }
  0x29   : > { %2106 = vmatpush.bf16.msra.mxu1 %v2033_v24  ;;  %2107 = vmatpush.bf16.msra.mxu2 %v2033_v24 }
  0x2a   : > { %834 = vmatpush.bf16.msra.mxu0 %v2033_v24  ;;  %2108 = vmatpush.bf16.msra.mxu3 %v2033_v24  ;;  %v1122_v24 = vld [vmem:[%s2239_s15 + $0x68] sm:$0xff] }
  0x2b   : > { %1185 = vperm.xlu1 %2136, %v1119_v3   ;;  %v442_v3 = vunpack.c.2.s8 %v2364_v7 }
  0x2c   : > { %850 = vmatmul.bf16.vlgmr.msra.gmra.mxu1 %v584_v27  ;;  %865 = vmatmul.bf16.vlgmr.msra.gmra.mxu2 %v593_v28  ;;  %v536_v27 = vcvt.s32.f32 %v464_v17  ;;  %v551_v28 = vcvt.s32.f32 %v479_v18  ;;  %v1123_v18 = vld [vmem:[%s2239_s15 + $0x70] sm:$0xff] }
  0x2d   : > { %965 = vmatpush.bf16.msrb.mxu2 %v2056_v25  ;;  %896 = vmatpush.bf16.msrb.mxu1 %v2048_v26  ;;  %v578_v25 = vpack.c.bf16 %v512_v21, %v509_v20  ;;  %v533_v26 = vcvt.s32.f32 %v461_v16  ;;  %v514_v15 = vcvt.s32.f32 %v442_v3  ;;  %v447_v20 = vunpack.c.1.s8 %v412_v43 }
  0x2e   : > { %835 = vmatmul.bf16.vlgmr.msra.gmra.mxu0 %v575_v57  ;;  %v445_v21 = vunpack.c.2.s8 %v411_v42 }
  0x2f   : > { %v590_v32 = vpack.c.bf16 %v536_v27, %v533_v26 }
  0x30   : > { %1195 = vperm.xlu0 %2135, %v1121_v56   ;;  %v507_v56 = vcvt.s32.f32 %v435_v47  ;;  %v2416_v47 = vld [vmem:[%s2252_s23 + $0x72] sm:$0x3f] }
  0x31   : > { %966 = vmatpush.bf16.msrb.mxu2 %v2055_v29  ;;  %897 = vmatpush.bf16.msrb.mxu1 %v2047_v30  ;;  %v554_v29 = vcvt.s32.f32 %v482_v19  ;;  %v1127_v30 = vld [vmem:[%s2239_s15 + $0x90] sm:$0xff]  ;;  %v444_v19 = vunpack.c.1.s8 %v411_v42 }
  0x33   : > { %1200 = vperm.xlu1 %2136, %v1122_v24   ;;  %v599_v33 = vpack.c.bf16 %v554_v29, %v551_v28  ;;  %v517_v24 = vcvt.s32.f32 %v445_v21  ;;  %v1129_v28 = vld [vmem:[%s2239_s15 + $0xa0] sm:$0xff]  ;;  %v450_v29 = vunpack.c.1.s8 %v2258_v8 }
  0x35   : > { %967 = vmatpush.bf16.msrb.mxu2 %v2054_v37  ;;  %898 = vmatpush.bf16.msrb.mxu1 %v2046_v38  ;;  %v1113_v37 = vld [vmem:[%s2239_s15 + $0x20] sm:$0xff] }
  0x36   : > { %v1125_v38 = vld [vmem:[%s2239_s15 + $0x80] sm:$0xff]  ;;  %1155 = vperm.xlu2 %2137, %v1113_v37   ;;  %v1132_v37 = vld [vmem:[%s2239_s15 + $0xb8] sm:$0xff] }
  0x38   : > { %1210 = vperm.xlu0 %2135, %v1124_v4   ;;  %v1120_v4 = vld [vmem:[%s2239_s15 + $0x58] sm:$0xff] }
  0x39   : > { %968 = vmatpush.bf16.msrb.mxu2 %v2053_v48  ;;  %899 = vmatpush.bf16.msrb.mxu1 %v2045_v49  ;;  %v433_v48 = vunpack.c.2.s8 %v2315_v39  ;;  %v436_v49 = vunpack.c.2.s8 %v2319_v41  ;;  %v1117_v39 = vld [vmem:[%s2239_s15 + $0x40] sm:$0xff]  ;;  %v1131_v41 = vld [vmem:[%s2239_s15 + $0xb0] sm:$0xff] }
  0x3b   : > { %1215 = vperm.xlu1 %2136, %v1125_v38   ;;  %v505_v57 = vcvt.s32.f32 %v433_v48  ;;  %v522_v38 = vcvt.s32.f32 %v450_v29  ;;  %v485_v48 = vunpack.c.0.s8 %v2413_v46 }
  0x3c   : > { %855 = vmatmul.bf16.gmra.mxu1 %v587_v60  ;;  %870 = vmatmul.bf16.gmra.mxu2 %v596_v61  ;;  %v438_v61 = vunpack.c.1.s8 %v2361_v6 }
  0x3d   : > { %969 = vmatpush.bf16.msrb.mxu2 %v2052_v58  ;;  %900 = vmatpush.bf16.msrb.mxu1 %v2044_v59  ;;  %v508_v58 = vcvt.s32.f32 %v436_v49  ;;  %v576_v59 = vpack.c.bf16 %v507_v56, %v504_v55  ;;  %v488_v49 = vunpack.c.0.s8 %v2416_v47  ;;  %v528_v55 = vcvt.s32.f32 %v456_v51 }
  0x3e   : > { %840 = vmatmul.bf16.gmra.mxu0 %v578_v25  ;;  %1160 = vperm.xlu2 %2137, %v1114_v52   ;;  %v459_v52 = vunpack.c.1.s8 %v2300_v34 }
  0x3f   : > { %v577_v60 = vpack.c.bf16 %v508_v58, %v505_v57 }
  0x40   : > { %1225 = vperm.xlu0 %2135, %v1127_v30   ;;  %v453_v30 = vunpack.c.1.s8 %v2261_v9  ;;  %v531_v56 = vcvt.s32.f32 %v459_v52 }
  0x41   : > { %970 = vmatpush.bf16.msrb.mxu2 %v2051_v62  ;;  %901 = vmatpush.bf16.msrb.mxu1 %v2043_v63  ;;  %v441_v62 = vunpack.c.1.s8 %v2364_v7  ;;  %v439_v63 = vunpack.c.2.s8 %v2361_v6  ;;  %v448_v6 = vunpack.c.2.s8 %v412_v43  ;;  %v516_v7 = vcvt.s32.f32 %v444_v19 }
  0x43   : > { %1230 = vperm.xlu1 %2136, %v1128_v53   ;;  %v511_v14 = vcvt.s32.f32 %v439_v63  ;;  %v520_v25 = vcvt.s32.f32 %v448_v6  ;;  %v457_v53 = vunpack.c.2.s8 %v2295_v31  ;;  %v2064_v63 = vld [vmem:[%s2673_s4 + $0x38] sm:$0xff] }
  0x44   : > { %1582 = vmatpush.bf16.msrb.mxu0 %v2064_v63 }
  0x45   : > { %971 = vmatpush.bf16.msrb.mxu2 %v2050_v10  ;;  %902 = vmatpush.bf16.msrb.mxu1 %v2042_v13  ;;  %v510_v10 = vcvt.s32.f32 %v438_v61  ;;  %v513_v13 = vcvt.s32.f32 %v441_v62  ;;  %v580_v17 = vpack.c.bf16 %v514_v15, %v511_v14  ;;  %v583_v27 = vpack.c.bf16 %v520_v25, %v517_v24  ;;  %v2431_v61 = vld [vmem:[%s2252_s23 + $0x7e] sm:$0x3f]  ;;  %v2083_v62 = vld [vmem:[%s2674_s5 + $0x30] sm:$0xff]  ;;  %v2460_v24 = vld [vmem:[%s2252_s23 + $0x84] sm:$0x3f] }
  0x46   : > { %1175 = vperm.xlu2 %2137, %v1117_v39   ;;  %v529_v57 = vcvt.s32.f32 %v457_v53  ;;  %v465_v14 = vunpack.c.1.s8 %v2350_v1  ;;  %v463_v15 = vunpack.c.2.s8 %v2347_v0  ;;  %v2463_v25 = vld [vmem:[%s2252_s23 + $0x8a] sm:$0x3f] }
  0x47   : > { %v579_v16 = vpack.c.bf16 %v513_v13, %v510_v10  ;;  %v462_v13 = vunpack.c.1.s8 %v2347_v0 }
  0x48   : > { %1240 = vperm.xlu0 %2135, %v1130_v40   ;;  %v525_v40 = vcvt.s32.f32 %v453_v30  ;;  %v535_v21 = vcvt.s32.f32 %v463_v15 }
  0x49   : > { %972 = vmatpush.bf16.msrb.mxu2 %v2049_v22  ;;  %903 = vmatpush.bf16.msrb.mxu1 %v2041_v23  ;;  %v1126_v22 = vld [vmem:[%s2239_s15 + $0x88] sm:$0xff]  ;;  %v519_v23 = vcvt.s32.f32 %v447_v20  ;;  %v534_v19 = vcvt.s32.f32 %v462_v13  ;;  %v537_v20 = vcvt.s32.f32 %v465_v14  ;;  %v489_v13 = vunpack.c.1.s8 %v2416_v47 }
  0x4a   : > { %v585_v44 = vpack.c.bf16 %v525_v40, %v522_v38  ;;  %v468_v38 = vunpack.c.1.s8 %v2265_v11  ;;  %v471_v40 = vunpack.c.1.s8 %v2268_v12 }
  0x4b   : > { %1245 = vperm.xlu1 %2136, %v1131_v41   ;;  %v582_v26 = vpack.c.bf16 %v519_v23, %v516_v7  ;;  %v2428_v41 = vld [vmem:[%s2252_s23 + $0x78] sm:$0x3f]  ;;  %v591_v0 = vpack.c.bf16 %v537_v20, %v534_v19  ;;  %v2062_v23 = vld [vmem:[%s2673_s4 + $0x28] sm:$0xff] }
  0x4c   : > { %860 = vmatmul.bf16.gmra.mxu1 %v590_v32  ;;  %875 = vmatmul.bf16.gmra.mxu2 %v599_v33  ;;  %v451_v32 = vunpack.c.2.s8 %v2258_v8  ;;  %v454_v33 = vunpack.c.2.s8 %v2261_v9  ;;  %v557_v8 = vcvt.s32.f32 %v485_v48  ;;  %v560_v9 = vcvt.s32.f32 %v488_v49  ;;  %v2079_v48 = vld [vmem:[%s2674_s5 + $0x10] sm:$0xff] }
  0x4d   : > { %v491_v31 = vunpack.c.0.s8 %v2428_v41  ;;  %v540_v49 = vcvt.s32.f32 %v468_v38 }
  0x4e   : > { %845 = vmatmul.bf16.gmra.mxu0 %v581_v54  ;;  %1190 = vperm.xlu2 %2137, %v1120_v4   ;;  %v523_v42 = vcvt.s32.f32 %v451_v32  ;;  %v526_v43 = vcvt.s32.f32 %v454_v33  ;;  %v602_v50 = vpack.c.bf16 %v560_v9, %v557_v8  ;;  %v460_v54 = vunpack.c.2.s8 %v2300_v34  ;;  %v2080_v33 = vld [vmem:[%s2674_s5 + $0x18] sm:$0xff] }
  0x4f   : > { %v494_v34 = vunpack.c.0.s8 %v2431_v61  ;;  %v563_v3 = vcvt.s32.f32 %v491_v31  ;;  %v543_v8 = vcvt.s32.f32 %v471_v40  ;;  %v492_v40 = vunpack.c.1.s8 %v2428_v41 }
  0x50   : > { %v586_v45 = vpack.c.bf16 %v526_v43, %v523_v42  ;;  %880 = vmatmul.bf16.vlgmr.msra.gmra.mxu3 %v602_v50  ;;  %v532_v58 = vcvt.s32.f32 %v460_v54  ;;  %v469_v42 = vunpack.c.2.s8 %v2265_v11  ;;  %v472_v43 = vunpack.c.2.s8 %v2268_v12  ;;  %v2078_v50 = vld [vmem:[%s2674_s5 + $0x8] sm:$0xff]  ;;  %v2077_v54 = vld [vmem:[%s2674_s5] sm:$0xff] }
  0x51   : > { %v566_v4 = vcvt.s32.f32 %v494_v34  ;;  %v594_v51 = vpack.c.bf16 %v543_v8, %v540_v49  ;;  %v2058_v34 = vld [vmem:[%s2673_s4 + $0x8] sm:$0xff]  ;;  %v564_v49 = vcvt.s32.f32 %v492_v40 }
  0x52   : > { %v589_v39 = vpack.c.bf16 %v532_v58, %v529_v57  ;;  %v541_v9 = vcvt.s32.f32 %v469_v42  ;;  %v544_v11 = vcvt.s32.f32 %v472_v43  ;;  %v474_v58 = vunpack.c.1.s8 %v2303_v35 }
  0x53   : > { %v605_v10 = vpack.c.bf16 %v566_v4, %v563_v3  ;;  %v495_v42 = vunpack.c.1.s8 %v2431_v61  ;;  %v493_v43 = vunpack.c.2.s8 %v2428_v41 }
  0x54   : > { %v595_v52 = vpack.c.bf16 %v544_v11, %v541_v9 }
  0x55   : > { %v567_v8 = vcvt.s32.f32 %v495_v42  ;;  %v565_v9 = vcvt.s32.f32 %v493_v43 }
  0x56   : > { %1205 = vperm.xlu2 %2137, %v1123_v18   ;;  %v2063_v18 = vld [vmem:[%s2673_s4 + $0x30] sm:$0xff] }
  0x57   : > { %1583 = vmatpush.bf16.msrb.mxu0 %v2063_v18  ;;  %v2526_v18 = vcvt.s32.f32 %v489_v13 }
  0x5b   : > { %1584 = vmatpush.bf16.msrb.mxu0 %v2062_v23  ;;  %v483_v23 = vunpack.c.1.s8 %v2358_v5 }
  0x5c   : > { %904 = vmatmul.bf16.vlgmr.msrb.gmra.mxu1 %v576_v59  ;;  %973 = vmatmul.bf16.vlgmr.msrb.gmra.mxu2 %v577_v60  ;;  %v2084_v59 = vld [vmem:[%s2674_s5 + $0x38] sm:$0xff]  ;;  %v588_v60 = vpack.c.bf16 %v531_v56, %v528_v55  ;;  %v2059_v55 = vld [vmem:[%s2673_s4 + $0x10] sm:$0xff]  ;;  %v2065_v56 = vld [vmem:[%s2501_s24] sm:$0xff] }
  0x5d   : > { %1465 = vmatpush.bf16.msrb.mxu3 %v2084_v59  ;;  %v477_v59 = vunpack.c.1.s8 %v2306_v36 }
  0x5e   : > { %1220 = vperm.xlu2 %2137, %v1126_v22  }
  0x5f   : > { %v549_v63 = vcvt.s32.f32 %v477_v59 }
  0x60   : > { %885 = vmatmul.bf16.gmra.mxu3 %v605_v10  ;;  %v486_v10 = vunpack.c.1.s8 %v2413_v46 }
  0x61   : > { %1466 = vmatpush.bf16.msrb.mxu3 %v2083_v62  ;;  %v546_v62 = vcvt.s32.f32 %v474_v58 }
  0x63   : > { %v597_v15 = vpack.c.bf16 %v549_v63, %v546_v62  ;;  %v499_v62 = vunpack.c.2.s8 %v2460_v24  ;;  %v502_v63 = vunpack.c.2.s8 %v2463_v25 }
  0x66   : > { %1235 = vperm.xlu2 %2137, %v1129_v28  }
  0x6c   : > { %909 = vmatmul.bf16.gmra.mxu1 %v579_v16  ;;  %978 = vmatmul.bf16.gmra.mxu2 %v580_v17  ;;  %v466_v16 = vunpack.c.2.s8 %v2350_v1  ;;  %v2082_v17 = vld [vmem:[%s2674_s5 + $0x28] sm:$0xff]  ;;  %v2081_v1 = vld [vmem:[%s2674_s5 + $0x20] sm:$0xff] }
  0x6d   : > { %1467 = vmatpush.bf16.msrb.mxu3 %v2082_v17  ;;  %v2524_v17 = vcvt.s32.f32 %v486_v10 }
  0x6e   : > { %1250 = vperm.xlu2 %2137, %v1132_v37   ;;  %v538_v6 = vcvt.s32.f32 %v466_v16  ;;  %v2061_v37 = vld [vmem:[%s2673_s4 + $0x20] sm:$0xff] }
  0x6f   : > { %1585 = vmatpush.bf16.msrb.mxu0 %v2061_v37 }
  0x70   : > { %v592_v22 = vpack.c.bf16 %v538_v6, %v535_v21 }
  0x71   : > { %1468 = vmatpush.bf16.msrb.mxu3 %v2081_v1  ;;  %v480_v1 = vunpack.c.1.s8 %v2353_v2 }
  0x75   : > { %1469 = vmatpush.bf16.msrb.mxu3 %v2080_v33  ;;  %v555_v33 = vcvt.s32.f32 %v483_v23 }
  0x79   : > { %1470 = vmatpush.bf16.msrb.mxu3 %v2079_v48 }
  0x7c   : > { %914 = vmatmul.bf16.gmra.mxu1 %v582_v26  ;;  %983 = vmatmul.bf16.gmra.mxu2 %v583_v27  ;;  %v497_v26 = vunpack.c.0.s8 %v2460_v24  ;;  %v500_v27 = vunpack.c.0.s8 %v2463_v25 }
  0x7d   : > { %1471 = vmatpush.bf16.msrb.mxu3 %v2078_v50 }
  0x7e   : > { %v569_v28 = vcvt.s32.f32 %v497_v26  ;;  %v572_v29 = vcvt.s32.f32 %v500_v27  ;;  %v481_v26 = vunpack.c.2.s8 %v2353_v2  ;;  %v484_v27 = vunpack.c.2.s8 %v2358_v5 }
  0x80   : > { %v608_v32 = vpack.c.bf16 %v572_v29, %v569_v28  ;;  %v553_v37 = vcvt.s32.f32 %v481_v26  ;;  %v556_v38 = vcvt.s32.f32 %v484_v27 }
  0x81   : > { %1472 = vmatpush.bf16.msrb.mxu3 %v2077_v54 }
  0x82   : > { %890 = vmatmul.bf16.gmra.mxu3 %v608_v32  ;;  %v552_v32 = vcvt.s32.f32 %v480_v1  ;;  %v601_v48 = vpack.c.bf16 %v556_v38, %v553_v37 }
  0x84   : > { %v600_v5 = vpack.c.bf16 %v555_v33, %v552_v32 }
  0x8c   : > { %919 = vmatmul.bf16.gmra.mxu1 %v585_v44  ;;  %988 = vmatmul.bf16.gmra.mxu2 %v586_v45  ;;  %v2060_v45 = vld [vmem:[%s2673_s4 + $0x18] sm:$0xff] }
  0x8d   : > { %1586 = vmatpush.bf16.msrb.mxu0 %v2060_v45  ;;  %v496_v45 = vunpack.c.2.s8 %v2431_v61 }
  0x8f   : > { %v568_v11 = vcvt.s32.f32 %v496_v45  ;;  %v2069_v45 = vld [vmem:[%s2501_s24 + $0x20] sm:$0xff] }
  0x91   : > { %1587 = vmatpush.bf16.msrb.mxu0 %v2059_v55  ;;  %v2067_v55 = vld [vmem:[%s2501_s24 + $0x10] sm:$0xff] }
  0x92   : > { %1473 = vmatmul.bf16.vlgmr.msrb.gmra.mxu3 %v2065_v56  ;;  %v1136_v56 = vpop.permute.xlu0 %1135 }
  0x95   : > { %1588 = vmatpush.bf16.msrb.mxu0 %v2058_v34  ;;  %v501_v34 = vunpack.c.1.s8 %v2463_v25  ;;  %v1146_v25 = vpop.permute.xlu1 %1145 }
  0x9c   : > { %924 = vmatmul.bf16.gmra.mxu1 %v588_v60  ;;  %993 = vmatmul.bf16.gmra.mxu2 %v589_v39  ;;  %v475_v60 = vunpack.c.2.s8 %v2303_v35  ;;  %v478_v39 = vunpack.c.2.s8 %v2306_v36  ;;  %v487_v35 = vunpack.c.2.s8 %v2413_v46  ;;  %v490_v36 = vunpack.c.2.s8 %v2416_v47  ;;  %v2057_v46 = vld [vmem:[%s2673_s4] sm:$0xff] }
  0x9d   : > { %v603_v47 = vpack.c.bf16 %v2526_v18, %v2524_v17  ;;  %1589 = vmatpush.bf16.msrb.mxu0 %v2057_v46  ;;  %v574_v17 = vcvt.s32.f32 %v502_v63  ;;  %v1151_v38 = vpop.permute.xlu1 %1150 }
  0x9e   : > { %v547_v3 = vcvt.s32.f32 %v475_v60  ;;  %v550_v4 = vcvt.s32.f32 %v478_v39  ;;  %v2528_v19 = vcvt.s32.f32 %v487_v35  ;;  %v2530_v20 = vcvt.s32.f32 %v490_v36 }
  0x9f   : > { %v498_v39 = vunpack.c.1.s8 %v2460_v24  ;;  %v573_v35 = vcvt.s32.f32 %v501_v34  ;;  %v571_v36 = vcvt.s32.f32 %v499_v62  ;;  %v2068_v24 = vld [vmem:[%s2501_s24 + $0x18] sm:$0xff] }
  0xa0   : > { %v598_v16 = vpack.c.bf16 %v550_v4, %v547_v3  ;;  %v604_v6 = vpack.c.bf16 %v2530_v20, %v2528_v19 }
  0xa1   : > { %v570_v13 = vcvt.s32.f32 %v498_v39  ;;  %v610_v46 = vpack.c.bf16 %v574_v17, %v571_v36 }
  0xa3   : > { %v609_v20 = vpack.c.bf16 %v573_v35, %v570_v13 }
  0xa5   : > { %v1171_v13 = vpop.permute.xlu1 %1170 }
  0xa9   : > { %v2451_v7 = vpop.f32.mrf.mxu1 }
  0xab   : > { %v836_v29 = vpop.f32.mrf.mxu0 }
  0xac   : > { %929 = vmatmul.bf16.gmra.mxu1 %v591_v0  ;;  %998 = vmatmul.bf16.gmra.mxu2 %v592_v22  ;;  %v2066_v0 = vld [vmem:[%s2501_s24 + $0x8] sm:$0xff] }
  0xad   : > { %1478 = vmatmul.bf16.gmra.mxu3 %v2066_v0 }
  0xaf   : > { %v2467_v30 = vpop.f32.mrf.mxu2 }
  0xb1   : > { %v2479_v44 = vpop.f32.mrf.mxu1 }
  0xb3   : > { %v838_v54 = vpop.f32.mrf.mxu0 }
  0xb7   : > { %v2487_v12 = vpop.f32.mrf.mxu2 }
  0xb9   : > { %v2493_v53 = vpop.f32.mrf.mxu1 }
  0xbb   : > { %v841_v3 = vpop.f32.mrf.mxu0 }
  0xbc   : > { %934 = vmatmul.bf16.gmra.mxu1 %v594_v51  ;;  %1003 = vmatmul.bf16.gmra.mxu2 %v595_v52  ;;  %v606_v51 = vpack.c.bf16 %v567_v8, %v564_v49  ;;  %v607_v52 = vpack.c.bf16 %v568_v11, %v565_v9 }
  0xbd   : > { %1483 = vmatmul.bf16.gmra.mxu3 %v2067_v55 }
  0xbf   : > { %v2507_v57 = vpop.f32.mrf.mxu2 }
  0xc1   : > { %v2513_v31 = vpop.f32.mrf.mxu1 }
  0xc3   : > { %v843_v23 = vpop.f32.mrf.mxu0 }
  0xc7   : > { %v2522_v14 = vpop.f32.mrf.mxu2 }
  0xc9   : > { %v2532_v21 = vpop.f32.mrf.mxu1 }
  0xcc   : > { %939 = vmatmul.bf16.gmra.mxu1 %v597_v15  ;;  %1008 = vmatmul.bf16.gmra.mxu2 %v598_v16  ;;  %v1141_v15 = vpop.permute.xlu0 %1140 }
  0xcd   : > { %1488 = vmatmul.bf16.gmra.mxu3 %v2068_v24 }
  0xcf   : > { %v2542_v22 = vpop.f32.mrf.mxu2 }
  0xd1   : > { %v2548_v28 = vpop.f32.mrf.mxu1 }
  0xd3   : > { %v2564_v39 = vpop.f32.mrf.mxu3 }
  0xd7   : > { %v2554_v2 = vpop.f32.mrf.mxu2 }
  0xd9   : > { %v905_v50 = vpop.f32.mrf.mxu1 }
  0xda   : > { %v906_v41 = vadd.f32 %v905_v50, %v836_v29 }
  0xdc   : > { %944 = vmatmul.bf16.gmra.mxu1 %v600_v5  ;;  %1013 = vmatmul.bf16.gmra.mxu2 %v601_v48  ;;  %v1156_v5 = vpop.permute.xlu2 %1155 }
  0xdd   : > { %1493 = vmatmul.bf16.gmra.mxu3 %v2069_v45 }
  0xdf   : > { %v974_v58 = vpop.f32.mrf.mxu2 }
  0xe0   : > { %v975_v61 = vadd.f32 %v974_v58, %v906_v41 }
  0xe1   : > { %v907_v59 = vpop.f32.mrf.mxu1 }
  0xe2   : > { %v908_v60 = vadd.f32 %v907_v59, %v838_v54  ;;  %v1253_v18 = vmul.f32 %v1136_v56, %v975_v61 }
  0xe4   : > { %v1161_v56 = vpop.permute.xlu2 %1160 }
  0xe7   : > { %v976_v4 = vpop.f32.mrf.mxu2 }
  0xe8   : > { %v977_v10 = vadd.f32 %v976_v4, %v908_v60  ;;  %v1166_v4 = vpop.permute.xlu0 %1165 }
  0xe9   : > { %v910_v16 = vpop.f32.mrf.mxu1 }
  0xea   : > { %v1254_v19 = vmul.f32 %v1141_v15, %v977_v10  ;;  %v911_v27 = vadd.f32 %v910_v16, %v841_v3  ;;  %v2568_v16 = vpop.f32.mrf.mxu3 }
  0xec   : > { %949 = vmatmul.bf16.gmra.mxu1 %v603_v47  ;;  %1018 = vmatmul.bf16.gmra.mxu2 %v604_v6  ;;  %v1277_v0 = vpack.c.bf16 %v1254_v19, %v1253_v18  ;;  %v846_v47 = vpop.f32.mrf.mxu0  ;;  %v2071_v18 = vld [vmem:[%s2501_s24 + $0x30] sm:$0xff] }
  0xee   : > { %1590 = vmatmul.bf16.vlgmr.msrb.gmra.mxu0 %v1277_v0 }
  0xef   : > { %v979_v1 = vpop.f32.mrf.mxu2 }
  0xf0   : > { %v980_v29 = vadd.f32 %v979_v1, %v911_v27 }
  0xf1   : > { %v912_v26 = vpop.f32.mrf.mxu1 }
  0xf2   : > { %v913_v32 = vadd.f32 %v912_v26, %v843_v23  ;;  %v1255_v42 = vmul.f32 %v1146_v25, %v980_v29  ;;  %v1181_v25 = vpop.permute.xlu0 %1180  ;;  %v1176_v23 = vpop.permute.xlu2 %1175 }
  0xf4   : > { %v848_v9 = vpop.f32.mrf.mxu0 }
  0xf7   : > { %v981_v33 = vpop.f32.mrf.mxu2 }
  0xf8   : > { %v982_v37 = vadd.f32 %v981_v33, %v913_v32 }
  0xf9   : > { %v915_v40 = vpop.f32.mrf.mxu1 }
  0xfa   : > { %v1256_v43 = vmul.f32 %v1151_v38, %v982_v37  ;;  %v916_v8 = vadd.f32 %v915_v40, %v846_v47  ;;  %v2072_v37 = vld [vmem:[%s2501_s24 + $0x38] sm:$0xff] }
  0xfc   : > { %954 = vmatmul.bf16.gmra.mxu1 %v606_v51  ;;  %1023 = vmatmul.bf16.gmra.mxu2 %v607_v52  ;;  %v1278_v6 = vpack.c.bf16 %v1256_v43, %v1255_v42  ;;  %v2070_v52 = vld [vmem:[%s2501_s24 + $0x28] sm:$0xff] }
  0xfd   : > { %1498 = vmatmul.bf16.gmra.mxu3 %v2070_v52 }
  0xfe   : > { %1595 = vmatmul.bf16.gmra.mxu0 %v1278_v6  ;;  %v1186_v6 = vpop.permute.xlu1 %1185 }
  0xff   : > { %v984_v48 = vpop.f32.mrf.mxu2 }
 0x100   : > { %v985_v11 = vadd.f32 %v984_v48, %v916_v8 }
 0x101   : > { %v917_v49 = vpop.f32.mrf.mxu1 }
 0x102   : > { %v918_v50 = vadd.f32 %v917_v49, %v848_v9  ;;  %v1257_v41 = vmul.f32 %v1156_v5, %v985_v11  ;;  %v1191_v5 = vpop.permute.xlu2 %1190 }
 0x106   : > { %v1201_v52 = vpop.permute.xlu1 %1200 }
 0x107   : > { %v986_v54 = vpop.f32.mrf.mxu2 }
 0x108   : > { %v987_v55 = vadd.f32 %v986_v54, %v918_v50  ;;  %v2073_v50 = vld [vmem:[%s2501_s24 + $0x40] sm:$0xff] }
 0x109   : > { %v920_v58 = vpop.f32.mrf.mxu1 }
 0x10a   : > { %v1258_v59 = vmul.f32 %v1161_v56, %v987_v55  ;;  %v921_v34 = vadd.f32 %v920_v58, %v2451_v7  ;;  %v2571_v7 = vpop.f32.mrf.mxu3 }
 0x10c   : > { %959 = vmatmul.bf16.gmra.mxu1 %v609_v20  ;;  %1028 = vmatmul.bf16.gmra.mxu2 %v610_v46  ;;  %v1279_v51 = vpack.c.bf16 %v1258_v59, %v1257_v41  ;;  %v1196_v59 = vpop.permute.xlu0 %1195 }
 0x10d   : > { %1503 = vmatmul.bf16.gmra.mxu3 %v2071_v18  ;;  %v1206_v18 = vpop.permute.xlu2 %1205 }
 0x10e   : > { %1600 = vmatmul.bf16.gmra.mxu0 %v1279_v51 }
 0x10f   : > { %v989_v61 = vpop.f32.mrf.mxu2 }
 0x110   : > { %v990_v62 = vadd.f32 %v989_v61, %v921_v34 }
 0x111   : > { %v922_v60 = vpop.f32.mrf.mxu1 }
 0x112   : > { %v923_v63 = vadd.f32 %v922_v60, %v2479_v44  ;;  %v1259_v36 = vmul.f32 %v1166_v4, %v990_v62  ;;  %v2575_v32 = vpop.f32.mrf.mxu3 }
 0x117   : > { %v991_v3 = vpop.f32.mrf.mxu2 }
 0x118   : > { %v992_v10 = vadd.f32 %v991_v3, %v923_v63  ;;  %v2074_v3 = vld [vmem:[%s2501_s24 + $0x48] sm:$0xff] }
 0x119   : > { %v925_v35 = vpop.f32.mrf.mxu1 }
 0x11a   : > { %v1260_v15 = vmul.f32 %v1171_v13, %v992_v10  ;;  %v926_v44 = vadd.f32 %v925_v35, %v2493_v53  ;;  %v2579_v42 = vpop.f32.mrf.mxu3 }
 0x11c   : > { %v1280_v17 = vpack.c.bf16 %v1260_v15, %v1259_v36  ;;  %v1211_v15 = vpop.permute.xlu0 %1210 }
 0x11d   : > { %1508 = vmatmul.bf16.gmra.mxu3 %v2072_v37  ;;  %v1221_v37 = vpop.permute.xlu2 %1220 }
 0x11e   : > { %1605 = vmatmul.bf16.gmra.mxu0 %v1280_v17 }
 0x11f   : > { %v994_v19 = vpop.f32.mrf.mxu2 }
 0x120   : > { %v995_v46 = vadd.f32 %v994_v19, %v926_v44 }
 0x121   : > { %v927_v20 = vpop.f32.mrf.mxu1 }
 0x122   : > { %v928_v0 = vadd.f32 %v927_v20, %v2513_v31  ;;  %v1261_v27 = vmul.f32 %v1176_v23, %v995_v46  ;;  %v2582_v11 = vpop.f32.mrf.mxu3 }
 0x127   : > { %v996_v24 = vpop.f32.mrf.mxu2 }
 0x128   : > { %v997_v1 = vadd.f32 %v996_v24, %v928_v0  ;;  %v2075_v24 = vld [vmem:[%s2501_s24 + $0x50] sm:$0xff] }
 0x129   : > { %v930_v26 = vpop.f32.mrf.mxu1 }
 0x12a   : > { %v1262_v29 = vmul.f32 %v1181_v25, %v997_v1  ;;  %v931_v53 = vadd.f32 %v930_v26, %v2532_v21  ;;  %v1474_v56 = vpop.f32.mrf.mxu3 }
 0x12c   : > { %v1281_v33 = vpack.c.bf16 %v1262_v29, %v1261_v27  ;;  %v1216_v29 = vpop.permute.xlu1 %1215 }
 0x12d   : > { %1513 = vmatmul.bf16.gmra.mxu3 %v2073_v50 }
 0x12e   : > { %1610 = vmatmul.bf16.gmra.mxu0 %v1281_v33 }
 0x12f   : > { %v999_v38 = vpop.f32.mrf.mxu2 }
 0x130   : > { %v1000_v31 = vadd.f32 %v999_v38, %v931_v53 }
 0x131   : > { %v932_v40 = vpop.f32.mrf.mxu1 }
 0x132   : > { %v933_v43 = vadd.f32 %v932_v40, %v2548_v28  ;;  %v1263_v49 = vmul.f32 %v1186_v6, %v1000_v31  ;;  %v1476_v63 = vpop.f32.mrf.mxu3  ;;  %v2596_v31 = vld [vmem:[%s2675_s6] ss:$0 sm:$0xff]  ;;  %v2076_v6 = vld [vmem:[%s2501_s24 + $0x58] sm:$0xff] }
 0x137   : > { %v1001_v47 = vpop.f32.mrf.mxu2 }
 0x138   : > { %v1002_v45 = vadd.f32 %v1001_v47, %v933_v43 }
 0x139   : > { %v935_v48 = vpop.f32.mrf.mxu1 }
 0x13a   : > { %v1264_v8 = vmul.f32 %v1191_v5, %v1002_v45  ;;  %v936_v21 = vadd.f32 %v935_v48, %v2467_v30  ;;  %v1479_v13 = vpop.f32.mrf.mxu3 }
 0x13c   : > { %v1282_v9 = vpack.c.bf16 %v1264_v8, %v1263_v49 }
 0x13d   : > { %1518 = vmatmul.bf16.gmra.mxu3 %v2074_v3 }
 0x13e   : > { %1615 = vmatmul.bf16.gmra.mxu0 %v1282_v9 }
 0x13f   : > { %v1004_v54 = vpop.f32.mrf.mxu2 }
 0x140   : > { %v1005_v28 = vadd.f32 %v1004_v54, %v936_v21 }
 0x141   : > { %v937_v55 = vpop.f32.mrf.mxu1 }
 0x142   : > { %v938_v58 = vadd.f32 %v937_v55, %v2487_v12  ;;  %v1265_v60 = vmul.f32 %v1196_v59, %v1005_v28  ;;  %v1481_v0 = vpop.f32.mrf.mxu3  ;;  %v1231_v28 = vpop.permute.xlu1 %1230 }
 0x147   : > { %v1006_v41 = vpop.f32.mrf.mxu2 }
 0x148   : > { %v1007_v51 = vadd.f32 %v1006_v41, %v938_v58 }
 0x149   : > { %v940_v61 = vpop.f32.mrf.mxu1 }
 0x14a   : > { %v1266_v34 = vmul.f32 %v1201_v52, %v1007_v51  ;;  %v941_v30 = vadd.f32 %v940_v61, %v2507_v57  ;;  %v1484_v23 = vpop.f32.mrf.mxu3 }
 0x14c   : > { %v1283_v62 = vpack.c.bf16 %v1266_v34, %v1265_v60 }
 0x14d   : > { %1523 = vmatmul.bf16.gmra.mxu3 %v2075_v24 }
 0x14e   : > { %1620 = vmatmul.bf16.gmra.mxu0 %v1283_v62 }
 0x14f   : > { %v1009_v4 = vpop.f32.mrf.mxu2 }
 0x150   : > { %v1010_v35 = vadd.f32 %v1009_v4, %v941_v30 }
 0x151   : > { %v942_v10 = vpop.f32.mrf.mxu1 }
 0x152   : > { %v943_v12 = vadd.f32 %v942_v10, %v2522_v14  ;;  %v1267_v20 = vmul.f32 %v1206_v18, %v1010_v35  ;;  %v1486_v5 = vpop.f32.mrf.mxu3 }
 0x157   : > { %v1011_v36 = vpop.f32.mrf.mxu2 }
 0x158   : > { %v1012_v17 = vadd.f32 %v1011_v36, %v943_v12 }
 0x159   : > { %v945_v19 = vpop.f32.mrf.mxu1 }
 0x15a   : > { %v1268_v44 = vmul.f32 %v1211_v15, %v1012_v17  ;;  %v946_v57 = vadd.f32 %v945_v19, %v2542_v22  ;;  %v1489_v59 = vpop.f32.mrf.mxu3  ;;  %v1236_v17 = vpop.permute.xlu2 %1235 }
 0x15c   : > { %v1284_v46 = vpack.c.bf16 %v1268_v44, %v1267_v20 }
 0x15d   : > { %1528 = vmatmul.bf16.gmra.mxu3 %v2076_v6 }
 0x15e   : > { %1625 = vmatmul.bf16.gmra.mxu0 %v1284_v46 }
 0x15f   : > { %v1014_v25 = vpop.f32.mrf.mxu2 }
 0x160   : > { %v1015_v26 = vadd.f32 %v1014_v25, %v946_v57 }
 0x161   : > { %v947_v1 = vpop.f32.mrf.mxu1 }
 0x162   : > { %v948_v14 = vadd.f32 %v947_v1, %v2554_v2  ;;  %v1269_v40 = vmul.f32 %v1216_v29, %v1015_v26  ;;  %v1491_v3 = vpop.f32.mrf.mxu3 }
 0x167   : > { %v1016_v27 = vpop.f32.mrf.mxu2 }
 0x168   : > { %v1017_v33 = vadd.f32 %v1016_v27, %v948_v14 }
 0x169   : > { %v950_v38 = vpop.f32.mrf.mxu1 }
 0x16a   : > { %v1270_v53 = vmul.f32 %v1221_v37, %v1017_v33  ;;  %v951_v8 = vadd.f32 %v950_v38, %v2564_v39  ;;  %v1246_v38 = vpop.permute.xlu1 %1245 }
 0x16b   : > { %v1591_v43 = vpop.f32.mrf.mxu0 }
 0x16c   : > { %v1592_v47 = vadd.f32 %v1591_v43, %v1474_v56  ;;  %v1285_v22 = vpack.c.bf16 %v1270_v53, %v1269_v40  ;;  %v1226_v56 = vpop.permute.xlu0 %1225  ;;  %v1251_v40 = vpop.permute.xlu2 %1250 }
 0x16e   : > { %v1655_v2 = vadd.f32 %v2596_v31, %v1592_v47  ;;  %1630 = vmatmul.bf16.gmra.mxu0 %v1285_v22 }
 0x16f   : > { %v1019_v45 = vpop.f32.mrf.mxu2 }
 0x170   : > { %1679 = vst [vmem:[%s2603_s16] sm:$0xff] %v1655_v2  ;;  %v1020_v50 = vadd.f32 %v1019_v45, %v951_v8 }
 0x171   : > { %v952_v48 = vpop.f32.mrf.mxu1 }
 0x172   : > { %v953_v54 = vadd.f32 %v952_v48, %v2568_v16  ;;  %v1271_v51 = vmul.f32 %v1226_v56, %v1020_v50 }
 0x173   : > { %v1593_v49 = vpop.f32.mrf.mxu0 }
 0x174   : > { %v1594_v9 = vadd.f32 %v1593_v49, %v1476_v63  ;;  %v1241_v36 = vpop.permute.xlu0 %1240 }
 0x176   : > { %v1656_v55 = vadd.f32 %v2596_v31, %v1594_v9 }
 0x177   : > { %v1021_v21 = vpop.f32.mrf.mxu2 }
 0x178   : > { %1680 = vst [vmem:[%s2603_s16 + $0x8] sm:$0xff] %v1656_v55  ;;  %v1022_v58 = vadd.f32 %v1021_v21, %v953_v54 }
 0x179   : > { %v955_v41 = vpop.f32.mrf.mxu1 }
 0x17a   : > { %v1272_v52 = vmul.f32 %v1231_v28, %v1022_v58  ;;  %v956_v4 = vadd.f32 %v955_v41, %v2571_v7  ;;  %v1494_v7 = vpop.f32.mrf.mxu3 }
 0x17b   : > { %v1596_v61 = vpop.f32.mrf.mxu0 }
 0x17c   : > { %v1597_v60 = vadd.f32 %v1596_v61, %v1479_v13  ;;  %v1286_v39 = vpack.c.bf16 %v1272_v52, %v1271_v51 }
 0x17e   : > { %v1657_v34 = vadd.f32 %v2596_v31, %v1597_v60  ;;  %1635 = vmatmul.bf16.gmra.mxu0 %v1286_v39 }
 0x17f   : > { %v1024_v16 = vpop.f32.mrf.mxu2 }
 0x180   : > { %1681 = vst [vmem:[%s2603_s16 + $0x10] sm:$0xff] %v1657_v34  ;;  %v1025_v30 = vadd.f32 %v1024_v16, %v956_v4 }
 0x181   : > { %v957_v62 = vpop.f32.mrf.mxu1 }
 0x182   : > { %v958_v35 = vadd.f32 %v957_v62, %v2575_v32  ;;  %v1273_v19 = vmul.f32 %v1236_v17, %v1025_v30  ;;  %v1496_v33 = vpop.f32.mrf.mxu3 }
 0x183   : > { %v1598_v63 = vpop.f32.mrf.mxu0 }
 0x184   : > { %v1599_v10 = vadd.f32 %v1598_v63, %v1481_v0 }
 0x186   : > { %v1658_v12 = vadd.f32 %v2596_v31, %v1599_v10 }
 0x187   : > { %v1026_v13 = vpop.f32.mrf.mxu2 }
 0x188   : > { %1682 = vst [vmem:[%s2603_s16 + $0x18] sm:$0xff] %v1658_v12  ;;  %v1027_v15 = vadd.f32 %v1026_v13, %v958_v35 }
 0x189   : > { %v960_v18 = vpop.f32.mrf.mxu1 }
 0x18a   : > { %v1274_v20 = vmul.f32 %v1241_v36, %v1027_v15  ;;  %v961_v57 = vadd.f32 %v960_v18, %v2579_v42 }
 0x18b   : > { %v1601_v44 = vpop.f32.mrf.mxu0 }
 0x18c   : > { %v1602_v46 = vadd.f32 %v1601_v44, %v1484_v23  ;;  %v1287_v24 = vpack.c.bf16 %v1274_v20, %v1273_v19 }
 0x18e   : > { %v1659_v0 = vadd.f32 %v2596_v31, %v1602_v46  ;;  %1640 = vmatmul.bf16.gmra.mxu0 %v1287_v24 }
 0x18f   : > { %v1029_v32 = vpop.f32.mrf.mxu2 }
 0x190   : > { %1683 = vst [vmem:[%s2603_s16 + $0x20] sm:$0xff] %v1659_v0  ;;  %v1030_v14 = vadd.f32 %v1029_v32, %v961_v57 }
 0x191   : > { %v962_v25 = vpop.f32.mrf.mxu1 }
 0x192   : > { %v963_v27 = vadd.f32 %v962_v25, %v2582_v11  ;;  %v1275_v53 = vmul.f32 %v1246_v38, %v1030_v14  ;;  %v1499_v11 = vpop.f32.mrf.mxu3 }
 0x193   : > { %v1603_v1 = vpop.f32.mrf.mxu0 }
 0x194   : > { %v1604_v26 = vadd.f32 %v1603_v1, %v1486_v5 }
 0x196   : > { %v1660_v29 = vadd.f32 %v2596_v31, %v1604_v26 }
 0x197   : > { %v1031_v23 = vpop.f32.mrf.mxu2 }
 0x198   : > { %1684 = vst [vmem:[%s2603_s16 + $0x28] sm:$0xff] %v1660_v29  ;;  %v1032_v37 = vadd.f32 %v1031_v23, %v963_v27 }
 0x19a   : > { %v1276_v43 = vmul.f32 %v1251_v40, %v1032_v37  ;;  %v1501_v49 = vpop.f32.mrf.mxu3 }
 0x19b   : > { %v1606_v47 = vpop.f32.mrf.mxu0 }
 0x19c   : > { %v1607_v22 = vadd.f32 %v1606_v47, %v1489_v59  ;;  %v1288_v42 = vpack.c.bf16 %v1276_v43, %v1275_v53 }
 0x19e   : > { %v1661_v2 = vadd.f32 %v2596_v31, %v1607_v22  ;;  %1645 = vmatmul.bf16.gmra.mxu0 %v1288_v42 }
 0x1a0   : > { %1685 = vst [vmem:[%s2603_s16 + $0x30] sm:$0xff] %v1661_v2 }
 0x1a2   : > { %v1504_v55 = vpop.f32.mrf.mxu3 }
 0x1a3   : > { %v1608_v6 = vpop.f32.mrf.mxu0 }
 0x1a4   : > { %v1609_v45 = vadd.f32 %v1608_v6, %v1491_v3 }
 0x1a6   : > { %v1662_v5 = vadd.f32 %v2596_v31, %v1609_v45 }
 0x1a8   : > { %1686 = vst [vmem:[%s2603_s16 + $0x38] sm:$0xff] %v1662_v5 }
 0x1aa   : > { %v1506_v41 = vpop.f32.mrf.mxu3 }
 0x1ab   : > { %v1611_v48 = vpop.f32.mrf.mxu0 }
 0x1ac   : > { %v1612_v8 = vadd.f32 %v1611_v48, %v1494_v7 }
 0x1ae   : > { %v1663_v9 = vadd.f32 %v2596_v31, %v1612_v8 }
 0x1b0   : > { %1687 = vst [vmem:[%s2603_s16 + $0x40] sm:$0xff] %v1663_v9 }
 0x1b2   : > { %v1509_v61 = vpop.f32.mrf.mxu3 }
 0x1b3   : > { %v1613_v50 = vpop.f32.mrf.mxu0 }
 0x1b4   : > { %v1614_v54 = vadd.f32 %v1613_v50, %v1496_v33 }
 0x1b6   : > { %v1664_v21 = vadd.f32 %v2596_v31, %v1614_v54 }
 0x1b8   : > { %1688 = vst [vmem:[%s2603_s16 + $0x48] sm:$0xff] %v1664_v21 }
 0x1ba   : > { %v1511_v62 = vpop.f32.mrf.mxu3 }
 0x1bb   : > { %v1616_v56 = vpop.f32.mrf.mxu0 }
 0x1bc   : > { %v1617_v28 = vadd.f32 %v1616_v56, %v1499_v11 }
 0x1be   : > { %v1665_v58 = vadd.f32 %v2596_v31, %v1617_v28 }
 0x1c0   : > { %1689 = vst [vmem:[%s2603_s16 + $0x50] sm:$0xff] %v1665_v58 }
 0x1c2   : > { %v1514_v30 = vpop.f32.mrf.mxu3 }
 0x1c3   : > { %v1618_v59 = vpop.f32.mrf.mxu0 }
 0x1c4   : > { %v1619_v51 = vadd.f32 %v1618_v59, %v1501_v49 }
 0x1c6   : > { %v1666_v52 = vadd.f32 %v2596_v31, %v1619_v51 }
 0x1c8   : > { %1690 = vst [vmem:[%s2603_s16 + $0x58] sm:$0xff] %v1666_v52 }
 0x1ca   : > { %v1516_v15 = vpop.f32.mrf.mxu3 }
 0x1cb   : > { %v1621_v60 = vpop.f32.mrf.mxu0 }
 0x1cc   : > { %v1622_v39 = vadd.f32 %v1621_v60, %v1504_v55 }
 0x1ce   : > { %v1667_v34 = vadd.f32 %v2596_v31, %v1622_v39 }
 0x1d0   : > { %1691 = vst [vmem:[%s2603_s16 + $0x60] sm:$0xff] %v1667_v34 }
 0x1d2   : > { %v1519_v20 = vpop.f32.mrf.mxu3 }
 0x1d3   : > { %v1623_v16 = vpop.f32.mrf.mxu0 }
 0x1d4   : > { %v1624_v63 = vadd.f32 %v1623_v16, %v1506_v41 }
 0x1d6   : > { %v1668_v3 = vadd.f32 %v2596_v31, %v1624_v63 }
 0x1d8   : > { %1692 = vst [vmem:[%s2603_s16 + $0x68] sm:$0xff] %v1668_v3 }
 0x1da   : > { %v1521_v7 = vpop.f32.mrf.mxu3 }
 0x1db   : > { %v1626_v4 = vpop.f32.mrf.mxu0 }
 0x1dc   : > { %v1627_v10 = vadd.f32 %v1626_v4, %v1509_v61 }
 0x1de   : > { %v1669_v35 = vadd.f32 %v2596_v31, %v1627_v10 }
 0x1e0   : > { %1693 = vst [vmem:[%s2603_s16 + $0x70] sm:$0xff] %v1669_v35 }
 0x1e2   : > { %v1524_v26 = vpop.f32.mrf.mxu3 }
 0x1e3   : > { %v1628_v12 = vpop.f32.mrf.mxu0 }
 0x1e4   : > { %v1629_v13 = vadd.f32 %v1628_v12, %v1511_v62 }
 0x1e6   : > { %v1670_v36 = vadd.f32 %v2596_v31, %v1629_v13 }
 0x1e8   : > { %1694 = vst [vmem:[%s2603_s16 + $0x78] sm:$0xff] %v1670_v36 }
 0x1ea   : > { %v1526_v33 = vpop.f32.mrf.mxu3 }
 0x1eb   : > { %v1631_v17 = vpop.f32.mrf.mxu0 }
 0x1ec   : > { %v1632_v18 = vadd.f32 %v1631_v17, %v1514_v30 }
 0x1ee   : > { %v1671_v19 = vadd.f32 %v2596_v31, %v1632_v18 }
 0x1f0   : > { %1695 = vst [vmem:[%s2603_s16 + $0x80] sm:$0xff] %v1671_v19 }
 0x1f2   : > { %v1529_v53 = vpop.f32.mrf.mxu3 }
 0x1f3   : > { %v1633_v44 = vpop.f32.mrf.mxu0 }
 0x1f4   : > { %v1634_v46 = vadd.f32 %v1633_v44, %v1516_v15 }
 0x1f6   : > { %v1672_v24 = vadd.f32 %v2596_v31, %v1634_v46 }
 0x1f8   : > { %1696 = vst [vmem:[%s2603_s16 + $0x88] sm:$0xff] %v1672_v24 }
 0x1fa   : > { %v1531_v42 = vpop.f32.mrf.mxu3 }
 0x1fb   : > { %v1636_v0 = vpop.f32.mrf.mxu0 }
 0x1fc   : > { %v1637_v32 = vadd.f32 %v1636_v0, %v1519_v20 }
 0x1fe   : > { %v1673_v25 = vadd.f32 %v2596_v31, %v1637_v32 }
 0x200   : > { %1697 = vst [vmem:[%s2603_s16 + $0x90] sm:$0xff] %v1673_v25 }
 0x203   : > { %v1638_v1 = vpop.f32.mrf.mxu0 }
 0x204   : > { %v1639_v57 = vadd.f32 %v1638_v1, %v1521_v7 }
 0x206   : > { %v1674_v14 = vadd.f32 %v2596_v31, %v1639_v57 }
 0x208   : > { %1698 = vst [vmem:[%s2603_s16 + $0x98] sm:$0xff] %v1674_v14 }
 0x20b   : > { %v1641_v27 = vpop.f32.mrf.mxu0 }
 0x20c   : > { %v1642_v29 = vadd.f32 %v1641_v27, %v1524_v26 }
 0x20e   : > { %v1675_v23 = vadd.f32 %v2596_v31, %v1642_v29 }
 0x210   : > { %1699 = vst [vmem:[%s2603_s16 + $0xa0] sm:$0xff] %v1675_v23 }
 0x213   : > { %v1643_v37 = vpop.f32.mrf.mxu0 }
 0x214   : > { %v1644_v38 = vadd.f32 %v1643_v37, %v1526_v33 }
 0x216   : > { %v1676_v40 = vadd.f32 %v2596_v31, %v1644_v38 }
 0x218   : > { %1700 = vst [vmem:[%s2603_s16 + $0xa8] sm:$0xff] %v1676_v40 }
 0x21b   : > { %v1646_v43 = vpop.f32.mrf.mxu0 }
 0x21c   : > { %v1647_v47 = vadd.f32 %v1646_v43, %v1529_v53 }
 0x21e   : > { %v1677_v22 = vadd.f32 %v2596_v31, %v1647_v47 }
 0x220   : > { %1701 = vst [vmem:[%s2603_s16 + $0xb0] sm:$0xff] %v1677_v22 }
 0x223   : > { %v1648_v2 = vpop.f32.mrf.mxu0 }
 0x224   : > { %v1649_v11 = vadd.f32 %v1648_v2, %v1531_v42 }
 0x226   : > { %v1678_v6 = vadd.f32 %v2596_v31, %v1649_v11 }
 0x228   : > { %1702 = vst [vmem:[%s2603_s16 + $0xb8] sm:$0xff] %v1678_v6 }
 0x229 PF: > { %s17_s26 = sadd.s32 1, %s2161_s26   ;;  %s2677_s24 = smov %s2157_s25 }
 0x22a   : > { %p14_p5 = scmp.ge.s32.totalorder %s17_s26, 4   ;;  %s2678_s25 = smov %s2680_s27 }
 0x22c   :  { %16 = sbr.rel (!%p14_p5) target bundleno = 2 (0x2), region = 95 }

</bundles_post_ra>
